<compile_context>
chip_gen: v7x
topology: tpu7x:2x2x1
jax: 0.10.0
libtpu: 0.0.40
codegen_flags: <defaults>
</compile_context>

<pallas_src>
import functools
import math

import jax
import jax.numpy as jnp
from jax.experimental import pallas as pl
from jax.experimental.pallas import tpu as pltpu

D_MODEL = 8
NUM_HEAD = 1
DIM_FF = 2048
NUM_LAYERS = 1
EPS = 1e-5

# ---- packed-slab row layout (all rows are D_MODEL wide) -------------------
_SA_WQ, _SA_WK, _SA_WV, _SA_WO = 0, 8, 16, 24
_CA_WQ, _CA_WK, _CA_WV, _CA_WO = 32, 40, 48, 56
_BIAS = 64          # 16-row bias/LN region (see order below)
_SLAB_ROWS = 80
# bias region row order:
#  0 sa_bq  1 sa_bk  2 sa_bv  3 sa_bo  4 ca_bq  5 ca_bk  6 ca_bv  7 ca_bo
#  8 n1_g   9 n1_b  10 n2_g  11 n2_b  12 n3_g  13 n3_b  14 ff2_b 15 (pad)


# --------------------------------------------------------------------------
# In-kernel helpers (all math in f32 on VMEM values)
# --------------------------------------------------------------------------
def _layer_norm(y, gamma, beta):
    mu = jnp.mean(y, axis=-1, keepdims=True)
    var = jnp.mean(jnp.square(y - mu), axis=-1, keepdims=True)
    return (y - mu) * jax.lax.rsqrt(var + EPS) * gamma + beta


def _attention(q_in, mem, bias, wq_t, bq, wk_t, bk, wv_t, bv, wo_t, bo):
    """Single-head attention; weights pre-transposed, 1/sqrt(d) folded into wq_t/bq."""
    q = jnp.dot(q_in, wq_t, preferred_element_type=jnp.float32) + bq   # (N, E)
    k = jnp.dot(mem, wk_t, preferred_element_type=jnp.float32) + bk    # (N, E)
    v = jnp.dot(mem, wv_t, preferred_element_type=jnp.float32) + bv    # (N, E)
    # scores = q @ k^T without materializing a transpose: contract last dims.
    scores = jax.lax.dot_general(
        q, k, (((1,), (1,)), ((), ())), preferred_element_type=jnp.float32) + bias
    scores = scores - jnp.max(scores, axis=-1, keepdims=True)
    p = jnp.exp(scores)
    p = p / jnp.sum(p, axis=-1, keepdims=True)                         # exact divide
    attn = jnp.dot(p, v, preferred_element_type=jnp.float32)           # (N, E)
    return jnp.dot(attn, wo_t, preferred_element_type=jnp.float32) + bo


# --------------------------------------------------------------------------
# Pallas kernel: one TransformerDecoderLayer on the full flattened token block
# --------------------------------------------------------------------------
def decoder_kernel(x_ref, slab_ref, ff1_ref, ff2_ref, o_ref, *, batch):
    x = x_ref[...].astype(jnp.float32)       # (N, E) flattened seq-first tokens
    slab = slab_ref[...]                     # (80, E) packed small parameters
    n = x.shape[0]

    # Block-diagonal additive mask built in-kernel: row r = (s, b=r%batch) attends
    # to column c iff same batch element.
    rid = jax.lax.broadcasted_iota(jnp.int32, (n, n), 0)
    cid = jax.lax.broadcasted_iota(jnp.int32, (n, n), 1)
    bias = jnp.where((rid % batch) == (cid % batch), 0.0, -1e9).astype(jnp.float32)

    b_rows = slab[_BIAS:_BIAS + 16]          # (16, E) bias / LN region

    # ---- self-attention block (post-norm, norm_first=False) ----
    sa = _attention(x, x, bias,
                    slab[_SA_WQ:_SA_WQ + 8], b_rows[0:1],
                    slab[_SA_WK:_SA_WK + 8], b_rows[1:2],
                    slab[_SA_WV:_SA_WV + 8], b_rows[2:3],
                    slab[_SA_WO:_SA_WO + 8], b_rows[3:4])
    x1 = _layer_norm(x + sa, b_rows[8:9], b_rows[9:10])

    # ---- cross-attention block (memory = original x, see TODO above) ----
    ca = _attention(x1, x, bias,
                    slab[_CA_WQ:_CA_WQ + 8], b_rows[4:5],
                    slab[_CA_WK:_CA_WK + 8], b_rows[5:6],
                    slab[_CA_WV:_CA_WV + 8], b_rows[6:7],
                    slab[_CA_WO:_CA_WO + 8], b_rows[7:8])
    x2 = _layer_norm(x1 + ca, b_rows[10:11], b_rows[11:12])

    # ---- feed-forward block (Linear -> ReLU -> Linear) ----
    # ff1_ref: rows 0:8 = W1^T (E, dff) lane-dense, row 8 = b1.
    h = jnp.maximum(
        jnp.dot(x2, ff1_ref[0:8, :], preferred_element_type=jnp.float32)
        + ff1_ref[8:9, :], 0.0)                                        # (N, dff)
    # ff2_ref kept in natural lane-dense (E, dff) layout: compute h @ W2^T on the MXU.
    ff = jax.lax.dot_general(
        h, ff2_ref[...], (((1,), (1,)), ((), ())),
        preferred_element_type=jnp.float32) + b_rows[14:15]            # (N, E)
    x3 = _layer_norm(x2 + ff, b_rows[12:13], b_rows[13:14])

    o_ref[...] = x3.astype(o_ref.dtype)


# --------------------------------------------------------------------------
# One-time parameter preprocessing (hoisted out of the per-call hot path)
# --------------------------------------------------------------------------
def prepare_params(params, d_model=D_MODEL):
    e = d_model
    scale = 1.0 / math.sqrt(e)

    def attn_parts(w_in, b_in, w_out, b_out):
        wq, wk, wv = w_in[:e], w_in[e:2 * e], w_in[2 * e:]
        bq, bk, bv = b_in[:, :e], b_in[:, e:2 * e], b_in[:, 2 * e:]
        mats = [jnp.transpose(wq) * scale, jnp.transpose(wk),
                jnp.transpose(wv), jnp.transpose(w_out)]      # each (E, E)
        biases = [bq * scale, bk, bv, b_out]                  # each (1, E)
        return mats, biases

    sa_w, sa_b = attn_parts(params["sa_win"], params["sa_bin"],
                            params["sa_wout"], params["sa_bout"])
    ca_w, ca_b = attn_parts(params["ca_win"], params["ca_bin"],
                            params["ca_wout"], params["ca_bout"])

    bias_rows = (sa_b + ca_b
                 + [params["n1_g"], params["n1_b"], params["n2_g"], params["n2_b"],
                    params["n3_g"], params["n3_b"], params["ff2_b"],
                    jnp.zeros((1, e), jnp.float32)])
    slab = jnp.concatenate(sa_w + ca_w + bias_rows, axis=0).astype(jnp.float32)  # (80, E)

    # ff1: lane-dense (E, dff) transposed weight + bias row appended -> (E+1, dff)
    ff1 = jnp.concatenate([jnp.transpose(params["ff1_w"]),
                           params["ff1_b"]], axis=0).astype(jnp.float32)
    # ff2: keep natural lane-dense (E, dff) layout, no transpose.
    ff2_w = params["ff2_w"].astype(jnp.float32)

    return {"slab": slab, "ff1": ff1, "ff2_w": ff2_w}


# --------------------------------------------------------------------------
# Wrapper: seq-first (S, B, E) in / out, single grid step
# --------------------------------------------------------------------------
@jax.jit
def decoder_forward(x_sbe, slab, ff1, ff2_w):
    S, B, E = x_sbe.shape
    N = S * B
    dff = ff2_w.shape[1]
    # Seq-first flatten (contiguous -> free reshape, no transpose): row r = (s=r//B, b=r%B)
    x_flat = x_sbe.reshape(N, E)

    attn_flops = 2 * N * E * 4 * E + 4 * N * N * E
    flops = 2 * attn_flops + 4 * N * E * dff
    bytes_accessed = 4 * (2 * N * E + int(slab.size) + int(ff1.size) + int(ff2_w.size))
    cost = pl.CostEstimate(flops=flops,
                           transcendentals=2 * N * N + 6 * N,
                           bytes_accessed=bytes_accessed)

    out = pl.pallas_call(
        functools.partial(decoder_kernel, batch=B),
        out_shape=jax.ShapeDtypeStruct((N, E), x_sbe.dtype),
        grid=(1,),
        in_specs=[
            pl.BlockSpec((N, E), lambda i: (0, 0)),            # flattened tokens
            pl.BlockSpec(slab.shape, lambda i: (0, 0)),        # packed small params
            pl.BlockSpec(ff1.shape, lambda i: (0, 0)),         # W1^T + b1
            pl.BlockSpec(ff2_w.shape, lambda i: (0, 0)),       # W2 (natural layout)
        ],
        out_specs=pl.BlockSpec((N, E), lambda i: (0, 0)),
        compiler_params=pltpu.CompilerParams(dimension_semantics=("arbitrary",)),
        cost_estimate=cost,
    )(x_flat, slab, ff1, ff2_w)

    # num_layers = 1, so a single layer application.
    return out.reshape(S, B, E)


# --------------------------------------------------------------------------
# Pure-JAX reference (for correctness check)
# --------------------------------------------------------------------------
def decoder_ref(x_sbe, p):
    x = jnp.transpose(x_sbe, (1, 0, 2)).astype(jnp.float32)  # (B, S, E)

    def mha(q_in, kv_in, w_in, b_in, w_out, b_out):
        d = q_in.shape[-1]
        wq, wk, wv = w_in[:d], w_in[d:2 * d], w_in[2 * d:]
        bq, bk, bv = b_in[0, :d], b_in[0, d:2 * d], b_in[0, 2 * d:]
        q = q_in @ wq.T + bq
        k = kv_in @ wk.T + bk
        v = kv_in @ wv.T + bv
        s = jnp.einsum("bqd,bkd->bqk", q, k) / math.sqrt(d)
        pm = jax.nn.softmax(s, axis=-1)
        a = jnp.einsum("bqk,bkd->bqd", pm, v)
        return a @ w_out.T + b_out[0]

    def ln(y, g, b):
        mu = y.mean(-1, keepdims=True)
        var = ((y - mu) ** 2).mean(-1, keepdims=True)
        return (y - mu) / jnp.sqrt(var + EPS) * g[0] + b[0]

    sa = mha(x, x, p["sa_win"], p["sa_bin"], p["sa_wout"], p["sa_bout"])
    x1 = ln(x + sa, p["n1_g"], p["n1_b"])
    ca = mha(x1, x, p["ca_win"], p["ca_bin"], p["ca_wout"], p["ca_bout"])
    x2 = ln(x1 + ca, p["n2_g"], p["n2_b"])
    h = jax.nn.relu(x2 @ p["ff1_w"].T + p["ff1_b"][0])
    ff = h @ p["ff2_w"].T + p["ff2_b"][0]
    x3 = ln(x2 + ff, p["n3_g"], p["n3_b"])
    return jnp.transpose(x3, (1, 0, 2))


# --------------------------------------------------------------------------
# Deterministic parameter construction (synthetic, no checkpoint loading)
# --------------------------------------------------------------------------
def make_params(key, d_model=D_MODEL, dff=DIM_FF):
    ks = jax.random.split(key, 16)
    n = lambda k, shape, s=0.05: jax.random.normal(k, shape, jnp.float32) * s
    return {
        "sa_win": n(ks[0], (3 * d_model, d_model)),
        "sa_bin": n(ks[1], (1, 3 * d_model), 0.01),
        "sa_wout": n(ks[2], (d_model, d_model)),
        "sa_bout": n(ks[3], (1, d_model), 0.01),
        "ca_win": n(ks[4], (3 * d_model, d_model)),
        "ca_bin": n(ks[5], (1, 3 * d_model), 0.01),
        "ca_wout": n(ks[6], (d_model, d_model)),
        "ca_bout": n(ks[7], (1, d_model), 0.01),
        "ff1_w": n(ks[8], (dff, d_model)),
        "ff1_b": n(ks[9], (1, dff), 0.01),
        "ff2_w": n(ks[10], (d_model, dff)),
        "ff2_b": n(ks[11], (1, d_model), 0.01),
        "n1_g": jnp.ones((1, d_model), jnp.float32),
        "n1_b": jnp.zeros((1, d_model), jnp.float32),
        "n2_g": jnp.ones((1, d_model), jnp.float32),
        "n2_b": jnp.zeros((1, d_model), jnp.float32),
        "n3_g": jnp.ones((1, d_model), jnp.float32),
        "n3_b": jnp.zeros((1, d_model), jnp.float32),
    }


if __name__ == "__main__":
    key = jax.random.PRNGKey(0)
    k_x, k_p = jax.random.split(key)

    S, B, E = 8, 2, D_MODEL                                  # seq-first like PyTorch
    x = jax.random.normal(k_x, (S, B, E), jnp.float32)
    params = make_params(k_p)

    # One-time weight preprocessing, outside the per-call hot path.
    prepped = jax.tree_util.tree_map(jax.block_until_ready, prepare_params(params))

    out = decoder_forward(x, prepped["slab"], prepped["ff1"], prepped["ff2_w"])
    out = jax.block_until_ready(out)

    ref = jax.block_until_ready(decoder_ref(x, params))
    assert out.shape == (S, B, E)
    # tolerance accounts for TPU default matmul precision differences vs the XLA reference
    assert jnp.allclose(out, ref, atol=2e-3, rtol=2e-3), "mismatch vs pure-JAX reference"

    print("KERNEL_OK")
</pallas_src>

<mosaic_0001>
module attributes {stable_mosaic.version = 11 : i64} {
  func.func @decoder_kernel(%arg0: i32, %arg1: memref<16x8xf32, #tpu.memory_space<vmem>>, %arg2: memref<80x8xf32, #tpu.memory_space<vmem>>, %arg3: memref<9x2048xf32, #tpu.memory_space<vmem>>, %arg4: memref<8x2048xf32, #tpu.memory_space<vmem>>, %arg5: memref<16x8xf32, #tpu.memory_space<vmem>>) attributes {dimension_semantics = [#tpu.dimension_semantics<arbitrary>], iteration_bounds = array<i64: 1>, scalar_prefetch = 0 : i64, scratch_operands = 0 : i64, tpu.core_type = #tpu.core_type<tc>, window_params = [{pipeline_mode = #tpu.pipeline_mode<synchronous>, transform_indices = @transform_0, window_bounds = array<i64: 16, 8>}, {pipeline_mode = #tpu.pipeline_mode<synchronous>, transform_indices = @transform_1, window_bounds = array<i64: 80, 8>}, {pipeline_mode = #tpu.pipeline_mode<synchronous>, transform_indices = @transform_2, window_bounds = array<i64: 9, 2048>}, {pipeline_mode = #tpu.pipeline_mode<synchronous>, transform_indices = @transform_3, window_bounds = array<i64: 8, 2048>}, {pipeline_mode = #tpu.pipeline_mode<synchronous>, transform_indices = @transform_4, window_bounds = array<i64: 16, 8>}]} {
    %c0 = arith.constant 0 : index
    %c0_0 = arith.constant 0 : index
    %0 = vector.load %arg1[%c0, %c0_0] : memref<16x8xf32, #tpu.memory_space<vmem>>, vector<16x8xf32>
    %c0_1 = arith.constant 0 : index
    %c0_2 = arith.constant 0 : index
    %1 = vector.load %arg2[%c0_1, %c0_2] : memref<80x8xf32, #tpu.memory_space<vmem>>, vector<80x8xf32>
    %2 = tpu.iota {dimensions = array<i32: 0>} : vector<16x16xi32>
    %3 = tpu.iota {dimensions = array<i32: 1>} : vector<16x16xi32>
    %c2_i32 = arith.constant 2 : i32
    %c0_i32 = arith.constant 0 : i32
    %4 = arith.cmpi eq, %c2_i32, %c0_i32 : i32
    %c1_i32 = arith.constant 1 : i32
    %5 = arith.select %4, %c1_i32, %c2_i32 : i32
    %6 = vector.broadcast %5 : i32 to vector<16x16xi32>
    %7 = arith.remsi %2, %6 : vector<16x16xi32>
    %c0_i32_3 = arith.constant 0 : i32
    %8 = vector.broadcast %c0_i32_3 : i32 to vector<16x16xi32>
    %9 = arith.cmpi ne, %7, %8 : vector<16x16xi32>
    %c0_i32_4 = arith.constant 0 : i32
    %10 = vector.broadcast %c0_i32_4 : i32 to vector<16x16xi32>
    %11 = arith.cmpi slt, %7, %10 : vector<16x16xi32>
    %c0_i32_5 = arith.constant 0 : i32
    %12 = arith.cmpi slt, %5, %c0_i32_5 : i32
    %13 = vector.broadcast %12 : i1 to vector<16x16xi1>
    %14 = vector.broadcast %13 : vector<16x16xi1> to vector<16x16xi1>
    %15 = arith.xori %11, %14 : vector<16x16xi1>
    %16 = arith.andi %15, %9 : vector<16x16xi1>
    %17 = vector.broadcast %5 : i32 to vector<16x16xi32>
    %18 = arith.addi %7, %17 : vector<16x16xi32>
    %19 = arith.select %16, %18, %7 : vector<16x16xi1>, vector<16x16xi32>
    %c2_i32_6 = arith.constant 2 : i32
    %c0_i32_7 = arith.constant 0 : i32
    %20 = arith.cmpi eq, %c2_i32_6, %c0_i32_7 : i32
    %c1_i32_8 = arith.constant 1 : i32
    %21 = arith.select %20, %c1_i32_8, %c2_i32_6 : i32
    %22 = vector.broadcast %21 : i32 to vector<16x16xi32>
    %23 = arith.remsi %3, %22 : vector<16x16xi32>
    %c0_i32_9 = arith.constant 0 : i32
    %24 = vector.broadcast %c0_i32_9 : i32 to vector<16x16xi32>
    %25 = arith.cmpi ne, %23, %24 : vector<16x16xi32>
    %c0_i32_10 = arith.constant 0 : i32
    %26 = vector.broadcast %c0_i32_10 : i32 to vector<16x16xi32>
    %27 = arith.cmpi slt, %23, %26 : vector<16x16xi32>
    %c0_i32_11 = arith.constant 0 : i32
    %28 = arith.cmpi slt, %21, %c0_i32_11 : i32
    %29 = vector.broadcast %28 : i1 to vector<16x16xi1>
    %30 = vector.broadcast %29 : vector<16x16xi1> to vector<16x16xi1>
    %31 = arith.xori %27, %30 : vector<16x16xi1>
    %32 = arith.andi %31, %25 : vector<16x16xi1>
    %33 = vector.broadcast %21 : i32 to vector<16x16xi32>
    %34 = arith.addi %23, %33 : vector<16x16xi32>
    %35 = arith.select %32, %34, %23 : vector<16x16xi1>, vector<16x16xi32>
    %36 = arith.cmpi eq, %19, %35 : vector<16x16xi32>
    %cst = arith.constant 0.000000e+00 : f32
    %cst_12 = arith.constant -1.000000e+09 : f32
    %37 = vector.broadcast %cst : f32 to vector<16x16xf32>
    %38 = vector.broadcast %cst_12 : f32 to vector<16x16xf32>
    %39 = arith.select %36, %37, %38 : vector<16x16xi1>, vector<16x16xf32>
    %40 = vector.extract_strided_slice %1 {offsets = [64, 0], sizes = [16, 8], strides = [1, 1]} : vector<80x8xf32> to vector<16x8xf32>
    %41 = vector.extract_strided_slice %1 {offsets = [0, 0], sizes = [8, 8], strides = [1, 1]} : vector<80x8xf32> to vector<8x8xf32>
    %42 = vector.extract_strided_slice %40 {offsets = [0, 0], sizes = [1, 8], strides = [1, 1]} : vector<16x8xf32> to vector<1x8xf32>
    %43 = vector.extract_strided_slice %1 {offsets = [8, 0], sizes = [8, 8], strides = [1, 1]} : vector<80x8xf32> to vector<8x8xf32>
    %44 = vector.extract_strided_slice %40 {offsets = [1, 0], sizes = [1, 8], strides = [1, 1]} : vector<16x8xf32> to vector<1x8xf32>
    %45 = vector.extract_strided_slice %1 {offsets = [16, 0], sizes = [8, 8], strides = [1, 1]} : vector<80x8xf32> to vector<8x8xf32>
    %46 = vector.extract_strided_slice %40 {offsets = [2, 0], sizes = [1, 8], strides = [1, 1]} : vector<16x8xf32> to vector<1x8xf32>
    %47 = vector.extract_strided_slice %1 {offsets = [24, 0], sizes = [8, 8], strides = [1, 1]} : vector<80x8xf32> to vector<8x8xf32>
    %48 = vector.extract_strided_slice %40 {offsets = [3, 0], sizes = [1, 8], strides = [1, 1]} : vector<16x8xf32> to vector<1x8xf32>
    %cst_13 = arith.constant dense<0.000000e+00> : vector<16x8xf32>
    %49 = tpu.matmul %0, %41, %cst_13 {dimension_numbers = #tpu.dot_dimension_numbers<[1], [0], [0], [1], [0, 0, 1, 1], [], []>} : vector<16x8xf32>, vector<8x8xf32>, vector<16x8xf32> -> vector<16x8xf32>
    %50 = vector.broadcast %42 : vector<1x8xf32> to vector<16x8xf32>
    %51 = arith.addf %49, %50 : vector<16x8xf32>
    %cst_14 = arith.constant dense<0.000000e+00> : vector<16x8xf32>
    %52 = tpu.matmul %0, %43, %cst_14 {dimension_numbers = #tpu.dot_dimension_numbers<[1], [0], [0], [1], [0, 0, 1, 1], [], []>} : vector<16x8xf32>, vector<8x8xf32>, vector<16x8xf32> -> vector<16x8xf32>
    %53 = vector.broadcast %44 : vector<1x8xf32> to vector<16x8xf32>
    %54 = arith.addf %52, %53 : vector<16x8xf32>
    %cst_15 = arith.constant dense<0.000000e+00> : vector<16x8xf32>
    %55 = tpu.matmul %0, %45, %cst_15 {dimension_numbers = #tpu.dot_dimension_numbers<[1], [0], [0], [1], [0, 0, 1, 1], [], []>} : vector<16x8xf32>, vector<8x8xf32>, vector<16x8xf32> -> vector<16x8xf32>
    %56 = vector.broadcast %46 : vector<1x8xf32> to vector<16x8xf32>
    %57 = arith.addf %55, %56 : vector<16x8xf32>
    %cst_16 = arith.constant dense<0.000000e+00> : vector<16x16xf32>
    %58 = tpu.matmul %51, %54, %cst_16 {dimension_numbers = #tpu.dot_dimension_numbers<[1], [1], [0], [0], [0, 0, 1, 0], [], []>} : vector<16x8xf32>, vector<16x8xf32>, vector<16x16xf32> -> vector<16x16xf32>
    %59 = arith.addf %58, %39 : vector<16x16xf32>
    %cst_17 = arith.constant dense<0xFF800000> : vector<16xf32>
    %60 = vector.multi_reduction <maximumf>, %59, %cst_17 [1] : vector<16x16xf32> to vector<16xf32>
    %61 = vector.shape_cast %60 : vector<16xf32> to vector<16x1xf32>
    %62 = vector.broadcast %61 : vector<16x1xf32> to vector<16x16xf32>
    %63 = arith.subf %59, %62 : vector<16x16xf32>
    %64 = math.exp %63 : vector<16x16xf32>
    %cst_18 = arith.constant dense<0.000000e+00> : vector<16xf32>
    %65 = vector.multi_reduction <add>, %64, %cst_18 [1] : vector<16x16xf32> to vector<16xf32>
    %66 = vector.shape_cast %65 : vector<16xf32> to vector<16x1xf32>
    %67 = vector.broadcast %66 : vector<16x1xf32> to vector<16x16xf32>
    %68 = arith.divf %64, %67 : vector<16x16xf32>
    %cst_19 = arith.constant dense<0.000000e+00> : vector<16x8xf32>
    %69 = tpu.matmul %68, %57, %cst_19 {dimension_numbers = #tpu.dot_dimension_numbers<[1], [0], [0], [1], [0, 0, 1, 1], [], []>} : vector<16x16xf32>, vector<16x8xf32>, vector<16x8xf32> -> vector<16x8xf32>
    %cst_20 = arith.constant dense<0.000000e+00> : vector<16x8xf32>
    %70 = tpu.matmul %69, %47, %cst_20 {dimension_numbers = #tpu.dot_dimension_numbers<[1], [0], [0], [1], [0, 0, 1, 1], [], []>} : vector<16x8xf32>, vector<8x8xf32>, vector<16x8xf32> -> vector<16x8xf32>
    %71 = vector.broadcast %48 : vector<1x8xf32> to vector<16x8xf32>
    %72 = arith.addf %70, %71 : vector<16x8xf32>
    %73 = arith.addf %0, %72 : vector<16x8xf32>
    %74 = vector.extract_strided_slice %40 {offsets = [8, 0], sizes = [1, 8], strides = [1, 1]} : vector<16x8xf32> to vector<1x8xf32>
    %75 = vector.extract_strided_slice %40 {offsets = [9, 0], sizes = [1, 8], strides = [1, 1]} : vector<16x8xf32> to vector<1x8xf32>
    %cst_21 = arith.constant dense<0.000000e+00> : vector<16xf32>
    %76 = vector.multi_reduction <add>, %73, %cst_21 [1] : vector<16x8xf32> to vector<16xf32>
    %77 = vector.shape_cast %76 : vector<16xf32> to vector<16x1xf32>
    %cst_22 = arith.constant 8.000000e+00 : f32
    %78 = vector.broadcast %cst_22 : f32 to vector<16x1xf32>
    %79 = arith.divf %77, %78 : vector<16x1xf32>
    %80 = vector.broadcast %79 : vector<16x1xf32> to vector<16x8xf32>
    %81 = arith.subf %73, %80 : vector<16x8xf32>
    %82 = arith.mulf %81, %81 : vector<16x8xf32>
    %cst_23 = arith.constant dense<0.000000e+00> : vector<16xf32>
    %83 = vector.multi_reduction <add>, %82, %cst_23 [1] : vector<16x8xf32> to vector<16xf32>
    %84 = vector.shape_cast %83 : vector<16xf32> to vector<16x1xf32>
    %cst_24 = arith.constant 8.000000e+00 : f32
    %85 = vector.broadcast %cst_24 : f32 to vector<16x1xf32>
    %86 = arith.divf %84, %85 : vector<16x1xf32>
    %87 = vector.broadcast %79 : vector<16x1xf32> to vector<16x8xf32>
    %88 = arith.subf %73, %87 : vector<16x8xf32>
    %cst_25 = arith.constant 9.99999974E-6 : f32
    %89 = vector.broadcast %cst_25 : f32 to vector<16x1xf32>
    %90 = arith.addf %86, %89 : vector<16x1xf32>
    %91 = math.rsqrt %90 : vector<16x1xf32>
    %92 = vector.broadcast %91 : vector<16x1xf32> to vector<16x8xf32>
    %93 = arith.mulf %88, %92 : vector<16x8xf32>
    %94 = vector.broadcast %74 : vector<1x8xf32> to vector<16x8xf32>
    %95 = arith.mulf %93, %94 : vector<16x8xf32>
    %96 = vector.broadcast %75 : vector<1x8xf32> to vector<16x8xf32>
    %97 = arith.addf %95, %96 : vector<16x8xf32>
    %98 = vector.extract_strided_slice %1 {offsets = [32, 0], sizes = [8, 8], strides = [1, 1]} : vector<80x8xf32> to vector<8x8xf32>
    %99 = vector.extract_strided_slice %40 {offsets = [4, 0], sizes = [1, 8], strides = [1, 1]} : vector<16x8xf32> to vector<1x8xf32>
    %100 = vector.extract_strided_slice %1 {offsets = [40, 0], sizes = [8, 8], strides = [1, 1]} : vector<80x8xf32> to vector<8x8xf32>
    %101 = vector.extract_strided_slice %40 {offsets = [5, 0], sizes = [1, 8], strides = [1, 1]} : vector<16x8xf32> to vector<1x8xf32>
    %102 = vector.extract_strided_slice %1 {offsets = [48, 0], sizes = [8, 8], strides = [1, 1]} : vector<80x8xf32> to vector<8x8xf32>
    %103 = vector.extract_strided_slice %40 {offsets = [6, 0], sizes = [1, 8], strides = [1, 1]} : vector<16x8xf32> to vector<1x8xf32>
    %104 = vector.extract_strided_slice %1 {offsets = [56, 0], sizes = [8, 8], strides = [1, 1]} : vector<80x8xf32> to vector<8x8xf32>
    %105 = vector.extract_strided_slice %40 {offsets = [7, 0], sizes = [1, 8], strides = [1, 1]} : vector<16x8xf32> to vector<1x8xf32>
    %cst_26 = arith.constant dense<0.000000e+00> : vector<16x8xf32>
    %106 = tpu.matmul %97, %98, %cst_26 {dimension_numbers = #tpu.dot_dimension_numbers<[1], [0], [0], [1], [0, 0, 1, 1], [], []>} : vector<16x8xf32>, vector<8x8xf32>, vector<16x8xf32> -> vector<16x8xf32>
    %107 = vector.broadcast %99 : vector<1x8xf32> to vector<16x8xf32>
    %108 = arith.addf %106, %107 : vector<16x8xf32>
    %cst_27 = arith.constant dense<0.000000e+00> : vector<16x8xf32>
    %109 = tpu.matmul %0, %100, %cst_27 {dimension_numbers = #tpu.dot_dimension_numbers<[1], [0], [0], [1], [0, 0, 1, 1], [], []>} : vector<16x8xf32>, vector<8x8xf32>, vector<16x8xf32> -> vector<16x8xf32>
    %110 = vector.broadcast %101 : vector<1x8xf32> to vector<16x8xf32>
    %111 = arith.addf %109, %110 : vector<16x8xf32>
    %cst_28 = arith.constant dense<0.000000e+00> : vector<16x8xf32>
    %112 = tpu.matmul %0, %102, %cst_28 {dimension_numbers = #tpu.dot_dimension_numbers<[1], [0], [0], [1], [0, 0, 1, 1], [], []>} : vector<16x8xf32>, vector<8x8xf32>, vector<16x8xf32> -> vector<16x8xf32>
    %113 = vector.broadcast %103 : vector<1x8xf32> to vector<16x8xf32>
    %114 = arith.addf %112, %113 : vector<16x8xf32>
    %cst_29 = arith.constant dense<0.000000e+00> : vector<16x16xf32>
    %115 = tpu.matmul %108, %111, %cst_29 {dimension_numbers = #tpu.dot_dimension_numbers<[1], [1], [0], [0], [0, 0, 1, 0], [], []>} : vector<16x8xf32>, vector<16x8xf32>, vector<16x16xf32> -> vector<16x16xf32>
    %116 = arith.addf %115, %39 : vector<16x16xf32>
    %cst_30 = arith.constant dense<0xFF800000> : vector<16xf32>
    %117 = vector.multi_reduction <maximumf>, %116, %cst_30 [1] : vector<16x16xf32> to vector<16xf32>
    %118 = vector.shape_cast %117 : vector<16xf32> to vector<16x1xf32>
    %119 = vector.broadcast %118 : vector<16x1xf32> to vector<16x16xf32>
    %120 = arith.subf %116, %119 : vector<16x16xf32>
    %121 = math.exp %120 : vector<16x16xf32>
    %cst_31 = arith.constant dense<0.000000e+00> : vector<16xf32>
    %122 = vector.multi_reduction <add>, %121, %cst_31 [1] : vector<16x16xf32> to vector<16xf32>
    %123 = vector.shape_cast %122 : vector<16xf32> to vector<16x1xf32>
    %124 = vector.broadcast %123 : vector<16x1xf32> to vector<16x16xf32>
    %125 = arith.divf %121, %124 : vector<16x16xf32>
    %cst_32 = arith.constant dense<0.000000e+00> : vector<16x8xf32>
    %126 = tpu.matmul %125, %114, %cst_32 {dimension_numbers = #tpu.dot_dimension_numbers<[1], [0], [0], [1], [0, 0, 1, 1], [], []>} : vector<16x16xf32>, vector<16x8xf32>, vector<16x8xf32> -> vector<16x8xf32>
    %cst_33 = arith.constant dense<0.000000e+00> : vector<16x8xf32>
    %127 = tpu.matmul %126, %104, %cst_33 {dimension_numbers = #tpu.dot_dimension_numbers<[1], [0], [0], [1], [0, 0, 1, 1], [], []>} : vector<16x8xf32>, vector<8x8xf32>, vector<16x8xf32> -> vector<16x8xf32>
    %128 = vector.broadcast %105 : vector<1x8xf32> to vector<16x8xf32>
    %129 = arith.addf %127, %128 : vector<16x8xf32>
    %130 = arith.addf %97, %129 : vector<16x8xf32>
    %131 = vector.extract_strided_slice %40 {offsets = [10, 0], sizes = [1, 8], strides = [1, 1]} : vector<16x8xf32> to vector<1x8xf32>
    %132 = vector.extract_strided_slice %40 {offsets = [11, 0], sizes = [1, 8], strides = [1, 1]} : vector<16x8xf32> to vector<1x8xf32>
    %cst_34 = arith.constant dense<0.000000e+00> : vector<16xf32>
    %133 = vector.multi_reduction <add>, %130, %cst_34 [1] : vector<16x8xf32> to vector<16xf32>
    %134 = vector.shape_cast %133 : vector<16xf32> to vector<16x1xf32>
    %cst_35 = arith.constant 8.000000e+00 : f32
    %135 = vector.broadcast %cst_35 : f32 to vector<16x1xf32>
    %136 = arith.divf %134, %135 : vector<16x1xf32>
    %137 = vector.broadcast %136 : vector<16x1xf32> to vector<16x8xf32>
    %138 = arith.subf %130, %137 : vector<16x8xf32>
    %139 = arith.mulf %138, %138 : vector<16x8xf32>
    %cst_36 = arith.constant dense<0.000000e+00> : vector<16xf32>
    %140 = vector.multi_reduction <add>, %139, %cst_36 [1] : vector<16x8xf32> to vector<16xf32>
    %141 = vector.shape_cast %140 : vector<16xf32> to vector<16x1xf32>
    %cst_37 = arith.constant 8.000000e+00 : f32
    %142 = vector.broadcast %cst_37 : f32 to vector<16x1xf32>
    %143 = arith.divf %141, %142 : vector<16x1xf32>
    %144 = vector.broadcast %136 : vector<16x1xf32> to vector<16x8xf32>
    %145 = arith.subf %130, %144 : vector<16x8xf32>
    %cst_38 = arith.constant 9.99999974E-6 : f32
    %146 = vector.broadcast %cst_38 : f32 to vector<16x1xf32>
    %147 = arith.addf %143, %146 : vector<16x1xf32>
    %148 = math.rsqrt %147 : vector<16x1xf32>
    %149 = vector.broadcast %148 : vector<16x1xf32> to vector<16x8xf32>
    %150 = arith.mulf %145, %149 : vector<16x8xf32>
    %151 = vector.broadcast %131 : vector<1x8xf32> to vector<16x8xf32>
    %152 = arith.mulf %150, %151 : vector<16x8xf32>
    %153 = vector.broadcast %132 : vector<1x8xf32> to vector<16x8xf32>
    %154 = arith.addf %152, %153 : vector<16x8xf32>
    %c0_39 = arith.constant 0 : index
    %c0_40 = arith.constant 0 : index
    %155 = vector.load %arg3[%c0_39, %c0_40] : memref<9x2048xf32, #tpu.memory_space<vmem>>, vector<8x2048xf32>
    %cst_41 = arith.constant dense<0.000000e+00> : vector<16x2048xf32>
    %156 = tpu.matmul %154, %155, %cst_41 {dimension_numbers = #tpu.dot_dimension_numbers<[1], [0], [0], [1], [0, 0, 1, 1], [], []>} : vector<16x8xf32>, vector<8x2048xf32>, vector<16x2048xf32> -> vector<16x2048xf32>
    %c8 = arith.constant 8 : index
    %c0_42 = arith.constant 0 : index
    %157 = vector.load %arg3[%c8, %c0_42] : memref<9x2048xf32, #tpu.memory_space<vmem>>, vector<1x2048xf32>
    %158 = vector.broadcast %157 : vector<1x2048xf32> to vector<16x2048xf32>
    %159 = arith.addf %156, %158 : vector<16x2048xf32>
    %cst_43 = arith.constant 0.000000e+00 : f32
    %160 = vector.broadcast %cst_43 : f32 to vector<16x2048xf32>
    %161 = arith.maximumf %159, %160 : vector<16x2048xf32>
    %c0_44 = arith.constant 0 : index
    %c0_45 = arith.constant 0 : index
    %162 = vector.load %arg4[%c0_44, %c0_45] : memref<8x2048xf32, #tpu.memory_space<vmem>>, vector<8x2048xf32>
    %cst_46 = arith.constant dense<0.000000e+00> : vector<16x8xf32>
    %163 = tpu.matmul %161, %162, %cst_46 {dimension_numbers = #tpu.dot_dimension_numbers<[1], [1], [0], [0], [0, 0, 1, 0], [], []>} : vector<16x2048xf32>, vector<8x2048xf32>, vector<16x8xf32> -> vector<16x8xf32>
    %164 = vector.extract_strided_slice %40 {offsets = [14, 0], sizes = [1, 8], strides = [1, 1]} : vector<16x8xf32> to vector<1x8xf32>
    %165 = vector.broadcast %164 : vector<1x8xf32> to vector<16x8xf32>
    %166 = arith.addf %163, %165 : vector<16x8xf32>
    %167 = arith.addf %154, %166 : vector<16x8xf32>
    %168 = vector.extract_strided_slice %40 {offsets = [12, 0], sizes = [1, 8], strides = [1, 1]} : vector<16x8xf32> to vector<1x8xf32>
    %169 = vector.extract_strided_slice %40 {offsets = [13, 0], sizes = [1, 8], strides = [1, 1]} : vector<16x8xf32> to vector<1x8xf32>
    %cst_47 = arith.constant dense<0.000000e+00> : vector<16xf32>
    %170 = vector.multi_reduction <add>, %167, %cst_47 [1] : vector<16x8xf32> to vector<16xf32>
    %171 = vector.shape_cast %170 : vector<16xf32> to vector<16x1xf32>
    %cst_48 = arith.constant 8.000000e+00 : f32
    %172 = vector.broadcast %cst_48 : f32 to vector<16x1xf32>
    %173 = arith.divf %171, %172 : vector<16x1xf32>
    %174 = vector.broadcast %173 : vector<16x1xf32> to vector<16x8xf32>
    %175 = arith.subf %167, %174 : vector<16x8xf32>
    %176 = arith.mulf %175, %175 : vector<16x8xf32>
    %cst_49 = arith.constant dense<0.000000e+00> : vector<16xf32>
    %177 = vector.multi_reduction <add>, %176, %cst_49 [1] : vector<16x8xf32> to vector<16xf32>
    %178 = vector.shape_cast %177 : vector<16xf32> to vector<16x1xf32>
    %cst_50 = arith.constant 8.000000e+00 : f32
    %179 = vector.broadcast %cst_50 : f32 to vector<16x1xf32>
    %180 = arith.divf %178, %179 : vector<16x1xf32>
    %181 = vector.broadcast %173 : vector<16x1xf32> to vector<16x8xf32>
    %182 = arith.subf %167, %181 : vector<16x8xf32>
    %cst_51 = arith.constant 9.99999974E-6 : f32
    %183 = vector.broadcast %cst_51 : f32 to vector<16x1xf32>
    %184 = arith.addf %180, %183 : vector<16x1xf32>
    %185 = math.rsqrt %184 : vector<16x1xf32>
    %186 = vector.broadcast %185 : vector<16x1xf32> to vector<16x8xf32>
    %187 = arith.mulf %182, %186 : vector<16x8xf32>
    %188 = vector.broadcast %168 : vector<1x8xf32> to vector<16x8xf32>
    %189 = arith.mulf %187, %188 : vector<16x8xf32>
    %190 = vector.broadcast %169 : vector<1x8xf32> to vector<16x8xf32>
    %191 = arith.addf %189, %190 : vector<16x8xf32>
    %c0_52 = arith.constant 0 : index
    %c0_53 = arith.constant 0 : index
    %192 = vector.load %arg5[%c0_52, %c0_53] : memref<16x8xf32, #tpu.memory_space<vmem>>, vector<16x8xf32>
    tpu.vector_store %arg5[%c0_52, %c0_53], %191 {strides = array<i32>} : memref<16x8xf32, #tpu.memory_space<vmem>>, vector<16x8xf32>,
    return
  }
  func.func @transform_0(%arg0: i32) -> (i32, i32) {
    %c0_i32 = arith.constant 0 : i32
    %c0_i32_0 = arith.constant 0 : i32
    %c0_i32_1 = arith.constant 0 : i32
    return %c0_i32, %c0_i32_0 : i32, i32
  }
  func.func @transform_1(%arg0: i32) -> (i32, i32) {
    %c0_i32 = arith.constant 0 : i32
    %c0_i32_0 = arith.constant 0 : i32
    %c0_i32_1 = arith.constant 0 : i32
    return %c0_i32, %c0_i32_0 : i32, i32
  }
  func.func @transform_2(%arg0: i32) -> (i32, i32) {
    %c0_i32 = arith.constant 0 : i32
    %c0_i32_0 = arith.constant 0 : i32
    %c0_i32_1 = arith.constant 0 : i32
    return %c0_i32, %c0_i32_0 : i32, i32
  }
  func.func @transform_3(%arg0: i32) -> (i32, i32) {
    %c0_i32 = arith.constant 0 : i32
    %c0_i32_0 = arith.constant 0 : i32
    %c0_i32_1 = arith.constant 0 : i32
    return %c0_i32, %c0_i32_0 : i32, i32
  }
  func.func @transform_4(%arg0: i32) -> (i32, i32) {
    %c0_i32 = arith.constant 0 : i32
    %c0_i32_0 = arith.constant 0 : i32
    %c0_i32_1 = arith.constant 0 : i32
    return %c0_i32, %c0_i32_0 : i32, i32
  }
}

</mosaic_0001>

<bundles_post_ra>
// kernel: decoder_forward.1
= control target key start
LH: loop header
LB: loop body
LE: loop exit
PB: predicated region body
PF: predicated region fallthrough
CT: control target
= control target key end

     0   :  { %9 = vsyncpa [#allocation3], 0  ;;  %s3282_s0 = inlined_call_operand.vmem [shape: f32[16,8], index: 0, kind: input, shape index: {}]   ;;  %s3283_s1 = inlined_call_operand.vmem [shape: f32[80,8], index: 1, kind: input, shape index: {}]   ;;  %s3284_s2 = inlined_call_operand.hbm [shape: f32[9,2048], index: 2, kind: input, shape index: {}]   ;;  %s3285_s3 = inlined_call_operand.hbm [shape: f32[8,2048], index: 3, kind: input, shape index: {}]   ;;  %s3286_s4 = inlined_call_operand.hbm [shape: f32[16,8], index: 4, kind: output, shape index: {}]  }
   0x1   :  { %10 = vsyncpa [#allocation6], 0 }
   0x2   :  { %11 = vsyncpa [#allocation4], 0  ;;  %s2940_s15 = smov [#allocation2]   ;;  %s2868_s19 = scalar_lea.hbm %s3284_s2, 4096 }
   0x3   :  { %s21_s16 = sshll.u32 %s2940_s15, 4  ;;  %p2869_p0 = scmp.ne.s32.totalorder %s3284_s2, %s2868_s19  ;;  %s22_s16 = int_to_ptr.vmem [resolvable:$true] %s21_s16 }
   0x4   :  { %p2872_p1 = scmp.lt.u32.totalorder %s2868_s19, %s3284_s2 }
   0x6   :  { %p2874_p2 = pnand %p2872_p1, %p2869_p0 }
   0x8   :  { %2877 = shalt.err (!%p2874_p2)
}
   0x9   :  { %s2878_s24 = scalar_lea.vmem %s22_s16, 4096  ;;  %p2883_p4 = scmp.lt.s32.totalorder %s22_s16, %s22_s16 }
   0xa   :  { %p2879_p3 = scmp.ne.s32.totalorder %s22_s16, %s2878_s24  ;;  %p2884_p5 = scmp.lt.s32.totalorder %s2878_s24, %s2878_s24 }
   0xc   :  { %p2885_p6 = por %p2884_p5, %p2883_p4 }
   0xe   :  { %p2886_p7 = pnand %p2885_p6, %p2879_p3 }
  0x10   :  { %2889 = shalt.err (!%p2886_p7)
}
  0x11   :  { %s2941_s25 = smov 2048   ;;  %s2942_s26 = smov 128  }
  0x12   :  { %27 = dma.hbm_to_vmem [thread:$0]  %s3284_s2, 4096, %s22_s16, [#allocation3], %s2941_s25, %s2941_s25, %s2942_s26  }
  0x13   :  { %s2943_s29 = smov [#allocation5]   ;;  %s2890_s7 = scalar_lea.hbm %s3285_s3, 2048 }
  0x14   :  { %s34_s30 = sshll.u32 %s2943_s29, 4  ;;  %p2891_p8 = scmp.ne.s32.totalorder %s3285_s3, %s2890_s7  ;;  %s35_s30 = int_to_ptr.vmem [resolvable:$true] %s34_s30 }
  0x15   :  { %p2894_p9 = scmp.lt.u32.totalorder %s2890_s7, %s3285_s3 }
  0x17   :  { %p2896_p10 = pnand %p2894_p9, %p2891_p8 }
  0x19   :  { %2899 = shalt.err (!%p2896_p10)
}
  0x1a   :  { %s2900_s12 = scalar_lea.vmem %s35_s30, 2048  ;;  %p2905_p12 = scmp.lt.s32.totalorder %s35_s30, %s35_s30 }
  0x1b   :  { %p2901_p11 = scmp.ne.s32.totalorder %s35_s30, %s2900_s12  ;;  %p2906_p13 = scmp.lt.s32.totalorder %s2900_s12, %s2900_s12 }
  0x1d   :  { %p2907_p0 = por %p2906_p13, %p2905_p12 }
  0x1f   :  { %p2908_p1 = pnand %p2907_p0, %p2901_p11 }
  0x21   :  { %2911 = shalt.err (!%p2908_p1)
}
  0x22   :  { %37 = dma.hbm_to_vmem [thread:$0]  %s3285_s3, 2048, %s35_s30, [#allocation6]  }
  0x23   :  { %2934 = dma.done.wait [#allocation3], 4096  }
  0x24   :  { %2935 = vsyncadd [#allocation3], 4294963200 }
  0x25   :  { %2936 = dma.done.wait [#allocation6], 2048  }
  0x26   :  { %2937 = vsyncadd [#allocation6], 4294965248  ;;  %vm105_vm0 = vcmask 64512   ;;  %v47_v0 = vld [vmem:[%s3283_s1 + $0x8] sm:$0xff]  ;;  %v3004_v1 = vld [vmem:[%s3282_s0] sm:$0xff]  ;;  %v56_v4 = vlaneseq  ;;  %vm432_vm4 = vcmask 130048  }
  0x27   :  { %v3009_v2 = vld [vmem:[%s3282_s0 + $0x8] sm:$0xff]  ;;  %2749 = vmatprep.subr.mxu1 %v47_v0  ;;  %2751 = vmatprep.mubr.msk.f32.mxu1 %vm105_vm0, %v3004_v1  ;;  %v46_v3 = vld [vmem:[%s3283_s1] sm:$0xff]  ;;  %vm3043_vm1 = vmpackc.low %vm105_vm0, %vm105_vm0  ;;  %v2944_v27 = vmov -1e+09  }
  0x28   :  { %2750 = vmatpush3.msra.mxu1 %v47_v0  ;;  %2744 = vmatprep.subr.mxu0 %v46_v3  ;;  %v3024_v5 = vshrl.u32 %v56_v4, 7  ;;  %v3032_v7 = vld [vmem:[%s3283_s1 + $0x40] sm:$0xff]  ;;  %v48_v21 = vld [vmem:[%s3283_s1 + $0x10] sm:$0xff]  ;;  %v60_v22 = vand.u32 127, %v56_v4  ;;  %v49_v53 = vld [vmem:[%s3283_s1 + $0x18] sm:$0xff] }
  0x29   :  { %2752 = vmatmul.mubr.msk.f32.vlgmr.msra.gmra.mrb[0].mxu1 %vm105_vm0, %v3009_v2  ;;  %2745 = vmatpush3.msra.mxu0 %v46_v3 }
  0x2a   :  { %2746 = vmatprep.mubr.msk.f32.mxu0 %vm105_vm0, %v3004_v1  ;;  %v3027_v6 = vsub.s32 1, %v3024_v5  ;;  %v3035_v8 = vsub.s32 0, %v3024_v5  ;;  %2754 = vmatprep.subr.mxu0 %v48_v21  ;;  %v58_v23 = vadd.s32 8, %v3024_v5  ;;  %v89_v24 = vand.u32 1, %v60_v22 }
  0x2b   :  { %2747 = vmatmul.mubr.msk.f32.vlgmr.msra.gmra.mrb[0].mxu0 %vm105_vm0, %v3009_v2  ;;  %v65_v25 = vand.u32 1, %v3024_v5  ;;  %v3071_v46 = vsub.s32 2, %v3024_v5  ;;  %v3085_v62 = vsub.s32 3, %v3024_v5 }
  0x2c   :  { %2756 = vmatprep.mubr.msk.f32.mxu0 %vm105_vm0, %v3004_v1  ;;  %v190_v9 = vrot.slane %v3032_v7, %v3027_v6  ;;  %v104_v11 = vrot.slane %v3032_v7, %v3035_v8  ;;  %2755 = vmatpush3.msra.mxu0 %v48_v21  ;;  %v72_v26 = vand.u32 1, %v58_v23 }
  0x2d   :  { %vm97_vm2 = vcmp.eq.s32.totalorder %v65_v25, %v89_v24  ;;  %v269_v47 = vrot.slane %v3032_v7, %v3071_v46  ;;  %v539_v63 = vrot.slane %v3032_v7, %v3085_v62  ;;  %v51_v25 = vld [vmem:[%s3283_s1 + $0x28] sm:$0xff] }
  0x2e   :  { %vm98_vm3 = vcmp.eq.s32.totalorder %v72_v26, %v89_v24  ;;  %v3060_v28 = vsel %vm97_vm2, 0.0, %v2944_v27  ;;  %v50_v26 = vld [vmem:[%s3283_s1 + $0x20] sm:$0xff] }
  0x2f   :  { %2757 = vmatmul.mubr.msk.f32.vlgmr.msra.gmra.mrb[2].mxu0 %vm105_vm0, %v3009_v2  ;;  %v3062_v30 = vsel %vm98_vm3, 0.0, %v2944_v27 }
  0xfc   :  { %v2753_v10 = vpop.f32.mrb[0].mxu1 }
  0xfd   :  { %v263_v12 = vadd.f32 %v2753_v10, %v190_v9  ;;  %v257_v13 = vpop.f32.mrb[1].mxu1 }
  0xfe   :  { %v258_v14 = vadd.f32 %v257_v13, %v190_v9  ;;  %v2748_v15 = vpop.f32.mrb[0].mxu0 }
  0xff   :  { %v178_v17 = vpop.f32.mrb[1].mxu0  ;;  %v184_v20 = vadd.f32 %v2748_v15, %v104_v11 }
 0x100   :  { %v2812_v18 = vpack.c.bf16 %v263_v12, %v258_v14  ;;  %v179_v19 = vadd.f32 %v178_v17, %v104_v11 }
 0x102   :  { %2814 = vmatprep.subr.msk.bf16.mxu1 %vm3043_vm1, %v2812_v18  ;;  %2763 = vmatprep.mubr.msk.f32.mxu1 %vm105_vm0, %v179_v19  ;;  %v2758_v48 = vpop.f32.mrb[2].mxu0 }
 0x103   :  { %2817 = vmatpush3.bf16.xpose.msk.msra.mxu1 %vm3043_vm1, %v2812_v18  ;;  %v336_v49 = vpop.f32.mrb[3].mxu0  ;;  %v342_v50 = vadd.f32 %v2758_v48, %v269_v47 }
 0x104   :  { %v337_v51 = vadd.f32 %v336_v49, %v269_v47  ;;  %2778 = vmatprep.subr.mxu1 %v50_v26  ;;  %v3123_v47 = vsub.s32 5, %v3024_v5 }
 0x106   :  { %v2818_v52 = vpack.c.bf16 %v342_v50, %v337_v51  ;;  %v750_v48 = vrot.slane %v3032_v7, %v3123_v47 }
 0x108   :  { %2819 = vmatprep.subr.bf16.mxu0 %v2818_v52 }
 0x109   :  { %2821 = vmatpush3.bf16.msra.mxu0 %v2818_v52 }
 0x10a   :  { %2764 = vmatmul.mubr.msk.f32.vlgmr.msra.gmra.mrb[2].mxu1 %vm105_vm0, %v184_v20  ;;  %2773 = vmatprep.subr.mxu0 %v49_v53 }
 0x10b   :  { %2779 = vmatpush3.msra.mxu1 %v50_v26 }
 0x1dd   :  { %v2765_v29 = vpop.f32.mrb[2].mxu1 }
 0x1de   :  { %v423_v31 = vpop.f32.mrb[3].mxu1  ;;  %v429_v33 = vadd.f32 %v2765_v29, %v3062_v30 }
 0x1df   :  { %v424_v32 = vadd.f32 %v423_v31, %v3060_v28 }
 0x1e0   :  { %v436_v35 = vsel %vm432_vm4, %v429_v33, -inf }
 0x1e1   :  { %v433_v34 = vsel %vm432_vm4, %v424_v32, -inf }
 0x1e2   :  { %434 = vmax.xlane.f32.xlu0 %v433_v34 }
 0x1e6   :  { %437 = vmax.xlane.f32.xlu0 %v436_v35  ;;  %v3106_v35 = vld [vmem:[%s3283_s1 + $0x48] sm:$0xff] }
 0x26f   :  { %v435_v36 = vpop.xlane.xlu0 %434 }
 0x270   :  { %v439_v37 = vsub.f32 %v424_v32, %v435_v36  ;;  %v653_v36 = vrot.slane %v3106_v35, %v3035_v8 }
 0x272   :  { %v441_v38 = vmul.f32 1.442695, %v439_v37 }
 0x273   :  { %v438_v39 = vpop.xlane.xlu0 %437 }
 0x274   :  { %2840 = vpow2.f32 %v441_v38  ;;  %v440_v40 = vsub.f32 %v429_v33, %v438_v39 }
 0x276   :  { %v443_v41 = vmul.f32 1.442695, %v440_v40 }
 0x278   :  { %2842 = vpow2.f32 %v443_v41  ;;  %v659_v41 = vrot.slane %v3106_v35, %v3027_v6 }
 0x27e   :  { %v2841_v42 = vpop.eup %2840 }
 0x27f   :  { %v445_v43 = vsel %vm432_vm4, %v2841_v42, 0.0 }
 0x280   :  { %446 = vadd.xlane.f32.xlu1 %v445_v43 }
 0x282   :  { %v2843_v44 = vpop.eup %2842 }
 0x283   :  { %v448_v45 = vsel %vm432_vm4, %v2843_v44, 0.0 }
 0x284   :  { %449 = vadd.xlane.f32.xlu1 %v448_v45 }
 0x30d   :  { %v447_v54 = vpop.xlane.xlu1 %446 }
 0x30e   :  { %2844 = vrcp.f32 %v447_v54  ;;  %v3132_v54 = vsub.s32 4, %v3024_v5 }
 0x311   :  { %v450_v55 = vpop.xlane.xlu1 %449 }
 0x312   :  { %2846 = vrcp.f32 %v450_v55 }
 0x318   :  { %v2845_v56 = vpop.eup %2844 }
 0x319   :  { %v452_v57 = vmul.f32 %v2845_v56, %v2841_v42 }
 0x31b   :  { %2770 = vmatprep.mubr.msk.f32.mxu0 %vm432_vm4, %v452_v57 }
 0x31c   :  { %v2847_v58 = vpop.eup %2846 }
 0x31d   :  { %v454_v59 = vmul.f32 %v2847_v58, %v2843_v44 }
 0x31f   :  { %2771 = vmatmul.mubr.msk.f32.vlgmr.msra.gmra.mrb[4].mxu0 %vm432_vm4, %v454_v59  ;;  %v52_v59 = vld [vmem:[%s3283_s1 + $0x30] sm:$0xff] }
 0x320   :  { %2774 = vmatpush3.msra.mxu0 %v49_v53  ;;  %2788 = vmatprep.subr.mxu1 %v52_v59 }
 0x321   :  { %2783 = vmatprep.subr.mxu0 %v51_v25 }
 0x3f2   :  { %v2772_v60 = vpop.f32.mrb[4].mxu0 }
 0x3f3   :  { %v527_v61 = vpop.f32.mrb[5].mxu0 }
 0x3f4   :  { %2775 = vmatprep.mubr.msk.f32.mxu0 %vm105_vm0, %v527_v61 }
 0x3f5   :  { %2776 = vmatmul.mubr.msk.f32.vlgmr.msra.gmra.mrb[6].mxu0 %vm105_vm0, %v2772_v60 }
 0x3f6   :  { %2785 = vmatprep.mubr.msk.f32.mxu0 %vm105_vm0, %v3004_v1  ;;  %2784 = vmatpush3.msra.mxu0 %v51_v25 }
 0x3f9   :  { %2786 = vmatmul.mubr.msk.f32.vlgmr.msra.gmra.mrb[8].mxu0 %vm105_vm0, %v3009_v2 }
 0x4c8   :  { %v2777_v0 = vpop.f32.mrb[6].mxu0 }
 0x4c9   :  { %v618_v3 = vadd.f32 %v2777_v0, %v539_v63  ;;  %v612_v4 = vpop.f32.mrb[7].mxu0 }
 0x4ca   :  { %v613_v9 = vadd.f32 %v612_v4, %v539_v63 }
 0x4cb   :  { %v622_v10 = vadd.f32 %v618_v3, %v3009_v2 }
 0x4cc   :  { %v621_v11 = vadd.f32 %v613_v9, %v3004_v1  ;;  %v2787_v49 = vpop.f32.mrb[8].mxu0 }
 0x4cd   :  { %v626_v12 = vsel %vm105_vm0, %v622_v10, 0.0  ;;  %v823_v50 = vadd.f32 %v2787_v49, %v750_v48  ;;  %v817_v51 = vpop.f32.mrb[9].mxu0 }
 0x4ce   :  { %627 = vadd.xlane.f32.xlu1 %v626_v12  ;;  %v623_v13 = vsel %vm105_vm0, %v621_v11, 0.0  ;;  %v818_v52 = vadd.f32 %v817_v51, %v750_v48 }
 0x4cf   :  { %624 = vadd.xlane.f32.xlu0 %v623_v13 }
 0x4d0   :  { %v2822_v53 = vpack.c.bf16 %v823_v50, %v818_v52 }
 0x4d2   :  { %2824 = vmatprep.subr.msk.bf16.mxu0 %vm3043_vm1, %v2822_v53 }
 0x4d3   :  { %2827 = vmatpush3.bf16.xpose.msk.msra.mxu0 %vm3043_vm1, %v2822_v53 }
 0x55b   :  { %v628_v14 = vpop.xlane.xlu1 %627 }
 0x55c   :  { %v631_v15 = vmul.f32 0.125, %v628_v14  ;;  %v625_v17 = vpop.xlane.xlu0 %624 }
 0x55d   :  { %v630_v18 = vmul.f32 0.125, %v625_v17 }
 0x55e   :  { %v633_v19 = vsub.f32 %v622_v10, %v631_v15  ;;  %v3150_v15 = vsub.s32 6, %v3024_v5 }
 0x55f   :  { %v632_v20 = vsub.f32 %v621_v11, %v630_v18 }
 0x560   :  { %v635_v21 = vmul.f32 %v633_v19, %v633_v19  ;;  %v829_v17 = vrot.slane %v3032_v7, %v3150_v15 }
 0x561   :  { %v634_v22 = vmul.f32 %v632_v20, %v632_v20 }
 0x562   :  { %v639_v23 = vsel %vm105_vm0, %v635_v21, 0.0 }
 0x563   :  { %640 = vadd.xlane.f32.xlu1 %v639_v23  ;;  %v636_v24 = vsel %vm105_vm0, %v634_v22, 0.0  ;;  %v53_v23 = vld [vmem:[%s3283_s1 + $0x38] sm:$0xff]  ;;  %s2946_s1 = smov [#allocation7]  }
 0x564   :  { %637 = vadd.xlane.f32.xlu0 %v636_v24  ;;  %s2647_s11 = sshll.u32 %s2946_s1, 4  ;;  %s2648_s11 = int_to_ptr.vmem [resolvable:$true] %s2647_s11 }
 0x565   :  { %s2912_s12 = scalar_lea.vmem %s2648_s11, 256  ;;  %p2917_p3 = scmp.lt.s32.totalorder %s2648_s11, %s2648_s11 }
 0x566   :  { %p2913_p2 = scmp.ne.s32.totalorder %s2648_s11, %s2912_s12  ;;  %p2918_p4 = scmp.lt.s32.totalorder %s2912_s12, %s2912_s12 }
 0x568   :  { %p2919_p5 = por %p2918_p4, %p2917_p3 }
 0x56a   :  { %p2920_p6 = pnand %p2919_p5, %p2913_p2 }
 0x5f0   :  { %v641_v27 = vpop.xlane.xlu1 %640 }
 0x5f1   :  { %v643_v29 = vmul.f32 0.125, %v641_v27  ;;  %v638_v31 = vpop.xlane.xlu0 %637 }
 0x5f2   :  { %v642_v32 = vmul.f32 0.125, %v638_v31 }
 0x5f3   :  { %v645_v33 = vadd.f32 1e-05, %v643_v29 }
 0x5f4   :  { %v644_v34 = vadd.f32 1e-05, %v642_v32 }
 0x5f5   :  { %2848 = vrsqrt.f32 %v645_v33 }
 0x5f6   :  { %2850 = vrsqrt.f32 %v644_v34  ;;  %v3162_v34 = vsub.s32 7, %v3024_v5 }
 0x5ff   :  { %v2849_v37 = vpop.eup %2848 }
 0x600   :  { %v2851_v38 = vpop.eup %2850  ;;  %v649_v39 = vmul.f32 %v2849_v37, %v633_v19 }
 0x601   :  { %v648_v40 = vmul.f32 %v2851_v38, %v632_v20 }
 0x602   :  { %v655_v42 = vmul.f32 %v653_v36, %v649_v39 }
 0x603   :  { %v654_v43 = vmul.f32 %v653_v36, %v648_v40  ;;  %v1098_v36 = vrot.slane %v3032_v7, %v3162_v34 }
 0x604   :  { %v3114_v45 = vadd.f32 %v659_v41, %v655_v42 }
 0x605   :  { %v3112_v44 = vadd.f32 %v659_v41, %v654_v43 }
 0x607   :  { %2780 = vmatprep.mubr.msk.f32.mxu1 %vm105_vm0, %v3112_v44 }
 0x608   :  { %2781 = vmatmul.mubr.msk.f32.vlgmr.msra.gmra.mrb[4].mxu1 %vm105_vm0, %v3114_v45 }
 0x609   :  { %2790 = vmatprep.mubr.msk.f32.mxu1 %vm105_vm0, %v3004_v1  ;;  %v665_v1 = vrot.slane %v3032_v7, %v3132_v54  ;;  %2789 = vmatpush3.msra.mxu1 %v52_v59  ;;  %v1225_v59 = vld [vmem:[#allocation2 + $0x28] sm:$0xff] }
 0x60c   :  { %2791 = vmatmul.mubr.msk.f32.vlgmr.msra.gmra.mrb[6].mxu1 %vm105_vm0, %v3009_v2 }
 0x6db   :  { %v2782_v55 = vpop.f32.mrb[4].mxu1 }
 0x6dc   :  { %v738_v56 = vpop.f32.mrb[5].mxu1  ;;  %v744_v58 = vadd.f32 %v2782_v55, %v665_v1 }
 0x6dd   :  { %v739_v57 = vadd.f32 %v738_v56, %v665_v1  ;;  %v1223_v56 = vld [vmem:[#allocation2 + $0x18] sm:$0xff] }
 0x6df   :  { %2797 = vmatprep.mubr.msk.f32.mxu0 %vm105_vm0, %v739_v57  ;;  %v2792_v18 = vpop.f32.mrb[6].mxu1  ;;  %v1220_v57 = vld [vmem:[#allocation2] sm:$0xff] }
 0x6e0   :  { %2798 = vmatmul.mubr.msk.f32.vlgmr.msra.gmra.mrb[10].mxu0 %vm105_vm0, %v744_v58  ;;  %v896_v19 = vpop.f32.mrb[7].mxu1  ;;  %v902_v20 = vadd.f32 %v2792_v18, %v829_v17  ;;  %v1222_v58 = vld [vmem:[#allocation2 + $0x10] sm:$0xff]  ;;  %v1224_v18 = vld [vmem:[#allocation2 + $0x20] sm:$0xff] }
 0x6e1   :  { %v897_v21 = vadd.f32 %v896_v19, %v829_v17  ;;  %v1226_v19 = vld [vmem:[#allocation2 + $0x30] sm:$0xff] }
 0x6e3   :  { %v2828_v22 = vpack.c.bf16 %v902_v20, %v897_v21  ;;  %v1229_v20 = vld [vmem:[#allocation2 + $0x48] sm:$0xff]  ;;  %v1231_v21 = vld [vmem:[#allocation2 + $0x58] sm:$0xff] }
 0x6e5   :  { %2829 = vmatprep.subr.bf16.mxu1 %v2828_v22 }
 0x6e6   :  { %2831 = vmatpush3.bf16.msra.mxu1 %v2828_v22 }
 0x6e7   :  { %2807 = vmatprep.subr.mxu1 %v53_v23 }
 0x7b3   :  { %v2799_v16 = vpop.f32.mrb[10].mxu0 }
 0x7b4   :  { %v989_v60 = vadd.f32 %v2799_v16, %v3062_v30  ;;  %v983_v61 = vpop.f32.mrb[11].mxu0  ;;  %v2945_v16 = vmov 0.0  }
 0x7b5   :  { %v984_v63 = vadd.f32 %v983_v61, %v3060_v28  ;;  %1396 = vmatprep.mubr.f32.mxu0 %v2945_v16 }
 0x7b6   :  { %v995_v0 = vsel %vm432_vm4, %v989_v60, -inf }
 0x7b7   :  { %996 = vmax.xlane.f32.xlu1 %v995_v0  ;;  %v992_v3 = vsel %vm432_vm4, %v984_v63, -inf }
 0x7b8   :  { %993 = vmax.xlane.f32.xlu0 %v992_v3 }
 0x844   :  { %v997_v4 = vpop.xlane.xlu1 %996 }
 0x845   :  { %v999_v9 = vsub.f32 %v989_v60, %v997_v4  ;;  %v994_v10 = vpop.xlane.xlu0 %993  ;;  %v1227_v60 = vld [vmem:[#allocation2 + $0x38] sm:$0xff] }
 0x846   :  { %v998_v11 = vsub.f32 %v984_v63, %v994_v10 }
 0x847   :  { %v1002_v12 = vmul.f32 1.442695, %v999_v9 }
 0x848   :  { %v1000_v13 = vmul.f32 1.442695, %v998_v11  ;;  %v1211_v11 = vrot.slane %v3106_v35, %v3071_v46 }
 0x849   :  { %2852 = vpow2.f32 %v1002_v12 }
 0x84a   :  { %2854 = vpow2.f32 %v1000_v13  ;;  %v1217_v13 = vrot.slane %v3106_v35, %v3085_v62 }
 0x853   :  { %v2853_v2 = vpop.eup %2852 }
 0x854   :  { %v2855_v14 = vpop.eup %2854  ;;  %v1007_v30 = vsel %vm432_vm4, %v2853_v2, 0.0 }
 0x855   :  { %1008 = vadd.xlane.f32.xlu1 %v1007_v30  ;;  %v1004_v28 = vsel %vm432_vm4, %v2855_v14, 0.0 }
 0x856   :  { %1005 = vadd.xlane.f32.xlu0 %v1004_v28 }
 0x8e2   :  { %v1009_v24 = vpop.xlane.xlu1 %1008 }
 0x8e3   :  { %2856 = vrcp.f32 %v1009_v24  ;;  %v1006_v25 = vpop.xlane.xlu0 %1005  ;;  %v1230_v24 = vld [vmem:[#allocation2 + $0x50] sm:$0xff] }
 0x8e4   :  { %2858 = vrcp.f32 %v1006_v25  ;;  %v1233_v25 = vld [vmem:[#allocation2 + $0x68] sm:$0xff] }
 0x8ed   :  { %v2857_v26 = vpop.eup %2856 }
 0x8ee   :  { %v2859_v27 = vpop.eup %2858  ;;  %v1013_v31 = vmul.f32 %v2857_v26, %v2853_v2  ;;  %v1235_v26 = vld [vmem:[#allocation2 + $0x78] sm:$0xff] }
 0x8ef   :  { %v1011_v29 = vmul.f32 %v2859_v27, %v2855_v14  ;;  %v1232_v27 = vld [vmem:[#allocation2 + $0x60] sm:$0xff] }
 0x8f1   :  { %2804 = vmatprep.mubr.msk.f32.mxu1 %vm432_vm4, %v1011_v29  ;;  %v1234_v29 = vld [vmem:[#allocation2 + $0x70] sm:$0xff] }
 0x8f2   :  { %2805 = vmatmul.mubr.msk.f32.vlgmr.msra.gmra.mrb[8].mxu1 %vm432_vm4, %v1013_v31  ;;  %v1981_v31 = vld [vmem:[#allocation5 + $0x8] sm:$0xff] }
 0x8f3   :  { %2808 = vmatpush3.msra.mxu1 %v53_v23  ;;  %v1228_v23 = vld [vmem:[#allocation2 + $0x40] sm:$0xff] }
 0x8f4   :  { %1409 = vmatprep.subr.mxu1 %v1223_v56  ;;  %v1242_v56 = vld [vmem:[#allocation2 + $0xc0] ss:$8 sm:$0xf0] }
 0x9c5   :  { %v2806_v32 = vpop.f32.mrb[8].mxu1 }
 0x9c6   :  { %v1086_v33 = vpop.f32.mrb[9].mxu1 }
 0x9c7   :  { %2809 = vmatprep.mubr.msk.f32.mxu1 %vm105_vm0, %v1086_v33  ;;  %v1983_v33 = vld [vmem:[#allocation5 + $0x18] sm:$0xff] }
 0x9c8   :  { %2810 = vmatmul.mubr.msk.f32.vlgmr.msra.gmra.mrb[10].mxu1 %vm105_vm0, %v2806_v32  ;;  %v1980_v32 = vld [vmem:[#allocation5] sm:$0xff] }
 0x9c9   :  { %1410 = vmatpush1.msra.mxu1 %v1222_v58  ;;  %1473 = vmatprep.mubr.f32.mxu1 %v2945_v16 }
 0x9ca   :  { %1563 = vmatprep.subr.mxu1 %v1227_v60 }
 0xa9b   :  { %v2811_v37 = vpop.f32.mrb[10].mxu1 }
 0xa9c   :  { %v1177_v38 = vadd.f32 %v2811_v37, %v1098_v36  ;;  %v1171_v39 = vpop.f32.mrb[11].mxu1  ;;  %v1985_v37 = vld [vmem:[#allocation5 + $0x28] sm:$0xff] }
 0xa9d   :  { %v1172_v40 = vadd.f32 %v1171_v39, %v1098_v36  ;;  %v1982_v36 = vld [vmem:[#allocation5 + $0x10] sm:$0xff] }
 0xa9e   :  { %v1181_v41 = vadd.f32 %v1177_v38, %v3114_v45  ;;  %v1987_v38 = vld [vmem:[#allocation5 + $0x38] sm:$0xff] }
 0xa9f   :  { %v1180_v42 = vadd.f32 %v1172_v40, %v3112_v44  ;;  %v1221_v44 = vld [vmem:[#allocation2 + $0x8] sm:$0xff] }
 0xaa0   :  { %v1185_v43 = vsel %vm105_vm0, %v1181_v41, 0.0  ;;  %1332 = vmatprep.subr.mxu0 %v1221_v44  ;;  %v1237_v39 = vld [vmem:[#allocation2 + $0x80] ss:$8 sm:$0xf] }
 0xaa1   :  { %1186 = vadd.xlane.f32.xlu1 %v1185_v43  ;;  %v1182_v48 = vsel %vm105_vm0, %v1180_v42, 0.0  ;;  %1333 = vmatpush1.msra.mxu0 %v1220_v57  ;;  %v1238_v40 = vld [vmem:[#allocation2 + $0x80] ss:$8 sm:$0xf0] }
 0xaa2   :  { %1183 = vadd.xlane.f32.xlu0 %v1182_v48  ;;  %1486 = vmatprep.subr.mxu0 %v1225_v59  ;;  %v1241_v44 = vld [vmem:[#allocation2 + $0xc0] ss:$8 sm:$0xf] }
 0xb2e   :  { %v1187_v49 = vpop.xlane.xlu1 %1186 }
 0xb2f   :  { %v1189_v5 = vmul.f32 0.125, %v1187_v49  ;;  %v1184_v50 = vpop.xlane.xlu0 %1183 }
 0xb30   :  { %v1188_v51 = vmul.f32 0.125, %v1184_v50 }
 0xb31   :  { %v1191_v52 = vsub.f32 %v1181_v41, %v1189_v5  ;;  %v1239_v41 = vor.u32 %v1238_v40, %v1237_v39 }
 0xb32   :  { %v1190_v7 = vsub.f32 %v1180_v42, %v1188_v51 }
 0xb33   :  { %v1193_v53 = vmul.f32 %v1191_v52, %v1191_v52  ;;  %v1249_v42 = vrot.slane %v1239_v41, %v3035_v8  ;;  %v1257_v43 = vrot.slane %v1239_v41, %v3071_v46  ;;  %v1253_v48 = vrot.slane %v1239_v41, %v3027_v6 }
 0xb34   :  { %v1192_v1 = vmul.f32 %v1190_v7, %v1190_v7  ;;  %v1261_v49 = vrot.slane %v1239_v41, %v3085_v62  ;;  %v1273_v60 = vrot.slane %v1239_v41, %v3150_v15 }
 0xb35   :  { %v1197_v55 = vsel %vm105_vm0, %v1193_v53, 0.0 }
 0xb36   :  { %1198 = vadd.xlane.f32.xlu1 %v1197_v55  ;;  %v1194_v45 = vsel %vm105_vm0, %v1192_v1, 0.0 }
 0xb37   :  { %1195 = vadd.xlane.f32.xlu0 %v1194_v45  ;;  %v1265_v45 = vrot.slane %v1239_v41, %v3132_v54 }
 0xbc3   :  { %v1199_v61 = vpop.xlane.xlu1 %1198 }
 0xbc4   :  { %v1201_v63 = vmul.f32 0.125, %v1199_v61  ;;  %v1196_v0 = vpop.xlane.xlu0 %1195  ;;  %v1269_v61 = vrot.slane %v1239_v41, %v3123_v47 }
 0xbc5   :  { %v1200_v3 = vmul.f32 0.125, %v1196_v0 }
 0xbc6   :  { %v1203_v4 = vadd.f32 1e-05, %v1201_v63 }
 0xbc7   :  { %v1202_v9 = vadd.f32 1e-05, %v1200_v3 }
 0xbc8   :  { %2860 = vrsqrt.f32 %v1203_v4 }
 0xbc9   :  { %2862 = vrsqrt.f32 %v1202_v9 }
 0xbd2   :  { %v2861_v10 = vpop.eup %2860 }
 0xbd3   :  { %v2863_v12 = vpop.eup %2862  ;;  %v1207_v2 = vmul.f32 %v2861_v10, %v1191_v52 }
 0xbd4   :  { %v1206_v14 = vmul.f32 %v2863_v12, %v1190_v7  ;;  %v1986_v12 = vld [vmem:[#allocation5 + $0x30] sm:$0xff] }
 0xbd5   :  { %v1213_v28 = vmul.f32 %v1211_v11, %v1207_v2 }
 0xbd6   :  { %v1212_v30 = vmul.f32 %v1211_v11, %v1206_v14  ;;  %v1984_v11 = vld [vmem:[#allocation5 + $0x20] sm:$0xff]  ;;  %v1277_v14 = vrot.slane %v1239_v41, %v3162_v34 }
 0xbd7   :  { %v3184_v22 = vadd.f32 %v1217_v13, %v1213_v28  ;;  %v1991_v28 = vld [vmem:[#allocation5 + $0x58] sm:$0xff] }
 0xbd8   :  { %v3178_v17 = vadd.f32 %v1217_v13, %v1212_v30  ;;  %v1989_v30 = vld [vmem:[#allocation5 + $0x48] sm:$0xff] }
 0xbda   :  { %2688 = vmatmul.mubr.msk.f32.vlgmr.msra.gmra.mrb[12].mxu0 %vm105_vm0, %v3178_v17  ;;  %2690 = vmatmul.mubr.msk.f32.vlgmr.msra.gmra.mrb[12].mxu1 %vm105_vm0, %v3178_v17 }
 0xbdb   :  { %1487 = vmatpush1.msra.mxu0 %v1224_v18  ;;  %1564 = vmatpush1.msra.mxu1 %v1226_v19  ;;  %v3236_v18 = vor.u32 %v1242_v56, %v1241_v44 }
 0xbdc   :  { %1402 = vmatprep.mubr.f32.mxu0 %v2945_v16  ;;  %1479 = vmatprep.mubr.f32.mxu1 %v2945_v16 }
 0xbdd   :  { %1640 = vmatprep.subr.mxu0 %v1229_v20  ;;  %1717 = vmatprep.subr.mxu1 %v1231_v21  ;;  %v1289_v41 = vrot.slane %v3236_v18, %v3071_v46  ;;  %v1995_v46 = vld [vmem:[#allocation5 + $0x78] sm:$0xff] }
 0xbde   :  { %2689 = vmatmul.mubr.msk.f32.gmra.mrb[14].mxu0 %vm105_vm0, %v3184_v22  ;;  %2691 = vmatmul.mubr.msk.f32.gmra.mrb[14].mxu1 %vm105_vm0, %v3184_v22 }
 0xbdf   :  { %1550 = vmatprep.mubr.f32.mxu0 %v2945_v16  ;;  %1627 = vmatprep.mubr.f32.mxu1 %v2945_v16 }
 0xbe2   :  { %2692 = vmatmul.mubr.msk.f32.vlgmr.msra.gmra.mrb[16].mxu0 %vm105_vm0, %v3178_v17  ;;  %2694 = vmatmul.mubr.msk.f32.vlgmr.msra.gmra.mrb[16].mxu1 %vm105_vm0, %v3178_v17 }
 0xbe3   :  { %1641 = vmatpush1.msra.mxu0 %v1228_v23  ;;  %1718 = vmatpush1.msra.mxu1 %v1230_v24 }
 0xbe4   :  { %1556 = vmatprep.mubr.f32.mxu0 %v2945_v16  ;;  %1633 = vmatprep.mubr.f32.mxu1 %v2945_v16 }
 0xbe5   :  { %1794 = vmatprep.subr.mxu0 %v1233_v25  ;;  %1871 = vmatprep.subr.mxu1 %v1235_v26 }
 0xbe6   :  { %2693 = vmatmul.mubr.msk.f32.gmra.mrb[18].mxu0 %vm105_vm0, %v3184_v22  ;;  %2695 = vmatmul.mubr.msk.f32.gmra.mrb[18].mxu1 %vm105_vm0, %v3184_v22 }
 0xbe7   :  { %1704 = vmatprep.mubr.f32.mxu0 %v2945_v16  ;;  %1781 = vmatprep.mubr.f32.mxu1 %v2945_v16 }
 0xbea   :  { %2696 = vmatmul.mubr.msk.f32.vlgmr.msra.gmra.mrb[20].mxu0 %vm105_vm0, %v3178_v17  ;;  %2698 = vmatmul.mubr.msk.f32.vlgmr.msra.gmra.mrb[20].mxu1 %vm105_vm0, %v3178_v17 }
 0xbeb   :  { %1795 = vmatpush1.msra.mxu0 %v1232_v27  ;;  %1872 = vmatpush1.msra.mxu1 %v1234_v29 }
 0xbec   :  { %1710 = vmatprep.mubr.f32.mxu0 %v2945_v16  ;;  %1787 = vmatprep.mubr.f32.mxu1 %v2945_v16 }
 0xbed   :  { %2000 = vmatprep.subr.mxu0 %v1981_v31  ;;  %2075 = vmatprep.subr.mxu1 %v1983_v33 }
 0xbee   :  { %2697 = vmatmul.mubr.msk.f32.gmra.mrb[22].mxu0 %vm105_vm0, %v3184_v22  ;;  %2699 = vmatmul.mubr.msk.f32.gmra.mrb[22].mxu1 %vm105_vm0, %v3184_v22 }
 0xbef   :  { %1858 = vmatprep.mubr.f32.mxu0 %v2945_v16  ;;  %1935 = vmatprep.mubr.f32.mxu1 %v2945_v16 }
 0xbf2   :  { %2700 = vmatmul.mubr.msk.f32.vlgmr.msra.gmra.mrb[24].mxu0 %vm105_vm0, %v3178_v17  ;;  %2702 = vmatmul.mubr.msk.f32.vlgmr.msra.gmra.mrb[24].mxu1 %vm105_vm0, %v3178_v17 }
 0xbf3   :  { %1864 = vmatprep.mubr.f32.mxu0 %v2945_v16  ;;  %1941 = vmatprep.mubr.f32.mxu1 %v2945_v16 }
 0xbf4   :  { %2001 = vmatpush1.xpose.msra.mxu0 %v1980_v32  ;;  %2076 = vmatpush1.xpose.msra.mxu1 %v1982_v36  ;;  %v1281_v36 = vrot.slane %v3236_v18, %v3035_v8 }
 0xbf5   :  { %2150 = vmatprep.subr.mxu0 %v1985_v37  ;;  %2225 = vmatprep.subr.mxu1 %v1987_v38 }
 0xbf6   :  { %2701 = vmatmul.mubr.msk.f32.gmra.mrb[26].mxu0 %vm105_vm0, %v3184_v22  ;;  %2703 = vmatmul.mubr.msk.f32.gmra.mrb[26].mxu1 %vm105_vm0, %v3184_v22 }
 0xcad   :  { %v1398_v5 = vpop.f32.mrb[12].mxu0  ;;  %v1475_v50 = vpop.f32.mrb[12].mxu1 }
 0xcae   :  { %v1399_v51 = vadd.f32 %v1398_v5, %v1249_v42  ;;  %v1476_v52 = vadd.f32 %v1475_v50, %v1257_v43  ;;  %v1400_v7 = vpop.f32.mrb[13].mxu0  ;;  %v1477_v53 = vpop.f32.mrb[13].mxu1 }
 0xcaf   :  { %v1401_v1 = vadd.f32 %v1400_v7, %v1253_v48  ;;  %v1478_v55 = vadd.f32 %v1477_v53, %v1261_v49  ;;  %v1990_v7 = vld [vmem:[#allocation5 + $0x50] sm:$0xff] }
 0xcb0   :  { %v1948_v63 = vmax.f32 %v1399_v51, 0.0  ;;  %v1950_v0 = vmax.f32 %v1476_v52, 0.0  ;;  %v1988_v52 = vld [vmem:[#allocation5 + $0x40] sm:$0xff] }
 0xcb1   :  { %v1949_v57 = vmax.f32 %v1401_v1, 0.0  ;;  %v1951_v58 = vmax.f32 %v1478_v55, 0.0  ;;  %v1404_v59 = vpop.f32.mrb[14].mxu0  ;;  %v1481_v16 = vpop.f32.mrb[14].mxu1  ;;  %v1293_v1 = vrot.slane %v3236_v18, %v3085_v62  ;;  %v1993_v55 = vld [vmem:[#allocation5 + $0x68] sm:$0xff] }
 0xcb2   :  { %v1405_v3 = vadd.f32 %v1404_v59, %v1249_v42  ;;  %v1482_v4 = vadd.f32 %v1481_v16, %v1257_v43  ;;  %v1406_v9 = vpop.f32.mrb[15].mxu0  ;;  %v1483_v10 = vpop.f32.mrb[15].mxu1  ;;  %v1285_v42 = vrot.slane %v3236_v18, %v3027_v6 }
 0xcb3   :  { %v1407_v13 = vadd.f32 %v1406_v9, %v1253_v48  ;;  %v1484_v2 = vadd.f32 %v1483_v10, %v1261_v49  ;;  %2064 = vmatprep.mubr.f32.mxu0 %v1949_v57  ;;  %2139 = vmatprep.mubr.f32.mxu1 %v1951_v58 }
 0xcb4   :  { %2065 = vmatmul.mubr.f32.vlgmr.msra.gmra.mrb[28].mxu0 %v1948_v63  ;;  %2140 = vmatmul.mubr.f32.vlgmr.msra.gmra.mrb[28].mxu1 %v1950_v0  ;;  %v1964_v24 = vmax.f32 %v1405_v3, 0.0  ;;  %v1966_v25 = vmax.f32 %v1482_v4, 0.0  ;;  %v1297_v0 = vrot.slane %v3236_v18, %v3132_v54 }
 0xcb5   :  { %v1965_v19 = vmax.f32 %v1407_v13, 0.0  ;;  %v1967_v20 = vmax.f32 %v1484_v2, 0.0  ;;  %2151 = vmatpush1.xpose.msra.mxu0 %v1984_v11  ;;  %v1552_v21 = vpop.f32.mrb[16].mxu0  ;;  %v1629_v23 = vpop.f32.mrb[16].mxu1  ;;  %2226 = vmatpush1.xpose.msra.mxu1 %v1986_v12  ;;  %v1305_v11 = vrot.slane %v3236_v18, %v3150_v15  ;;  %v1301_v12 = vrot.slane %v3236_v18, %v3123_v47 }
 0xcb6   :  { %v1553_v26 = vadd.f32 %v1552_v21, %v1265_v45  ;;  %v1630_v27 = vadd.f32 %v1629_v23, %v1273_v60  ;;  %v1554_v29 = vpop.f32.mrb[17].mxu0  ;;  %v1631_v31 = vpop.f32.mrb[17].mxu1  ;;  %2300 = vmatprep.subr.mxu0 %v1989_v30  ;;  %2375 = vmatprep.subr.mxu1 %v1991_v28  ;;  %v1994_v21 = vld [vmem:[#allocation5 + $0x70] sm:$0xff] }
 0xcb7   :  { %v1555_v32 = vadd.f32 %v1554_v29, %v1269_v61  ;;  %v1632_v33 = vadd.f32 %v1631_v31, %v1277_v14  ;;  %2069 = vmatprep.mubr.f32.mxu0 %v1965_v19  ;;  %2144 = vmatprep.mubr.f32.mxu1 %v1967_v20  ;;  %v1992_v20 = vld [vmem:[#allocation5 + $0x60] sm:$0xff] }
 0xcb8   :  { %2070 = vmatmul.mubr.f32.gmra.mrb[30].mxu0 %v1964_v24  ;;  %2145 = vmatmul.mubr.f32.gmra.mrb[30].mxu1 %v1966_v25  ;;  %v1952_v43 = vmax.f32 %v1553_v26, 0.0  ;;  %v1954_v48 = vmax.f32 %v1630_v27, 0.0  ;;  %v1309_v25 = vrot.slane %v3236_v18, %v3162_v34 }
 0xcb9   :  { %v1953_v37 = vmax.f32 %v1555_v32, 0.0  ;;  %v1955_v38 = vmax.f32 %v1632_v33, 0.0  ;;  %v1558_v39 = vpop.f32.mrb[18].mxu0  ;;  %v1635_v40 = vpop.f32.mrb[18].mxu1 }
 0xcba   :  { %v1559_v49 = vadd.f32 %v1558_v39, %v1265_v45  ;;  %v1636_v5 = vadd.f32 %v1635_v40, %v1273_v60  ;;  %v1560_v50 = vpop.f32.mrb[19].mxu0  ;;  %v1637_v51 = vpop.f32.mrb[19].mxu1 }
 0xcbb   :  { %v1561_v53 = vadd.f32 %v1560_v50, %v1269_v61  ;;  %v1638_v8 = vadd.f32 %v1637_v51, %v1277_v14  ;;  %2214 = vmatprep.mubr.f32.mxu0 %v1953_v37  ;;  %2289 = vmatprep.mubr.f32.mxu1 %v1955_v38 }
 0xcbc   :  { %2215 = vmatmul.mubr.f32.vlgmr.msra.gmra.mrb[32].mxu0 %v1952_v43  ;;  %2290 = vmatmul.mubr.f32.vlgmr.msra.gmra.mrb[32].mxu1 %v1954_v48  ;;  %v1968_v57 = vmax.f32 %v1559_v49, 0.0  ;;  %v1970_v58 = vmax.f32 %v1636_v5, 0.0 }
 0xcbd   :  { %v1969_v6 = vmax.f32 %v1561_v53, 0.0  ;;  %v1971_v44 = vmax.f32 %v1638_v8, 0.0  ;;  %2301 = vmatpush1.xpose.msra.mxu0 %v1988_v52  ;;  %v1706_v45 = vpop.f32.mrb[20].mxu0  ;;  %v1783_v56 = vpop.f32.mrb[20].mxu1  ;;  %2376 = vmatpush1.xpose.msra.mxu1 %v1990_v7 }
 0xcbe   :  { %v1707_v59 = vadd.f32 %v1706_v45, %v1281_v36  ;;  %v1784_v16 = vadd.f32 %v1783_v56, %v1289_v41  ;;  %v1708_v60 = vpop.f32.mrb[21].mxu0  ;;  %v1785_v61 = vpop.f32.mrb[21].mxu1  ;;  %2450 = vmatprep.subr.mxu0 %v1993_v55  ;;  %2525 = vmatprep.subr.mxu1 %v1995_v46 }
 0xcbf   :  { %v1709_v63 = vadd.f32 %v1708_v60, %v1285_v42  ;;  %v1786_v62 = vadd.f32 %v1785_v61, %v1293_v1  ;;  %2219 = vmatprep.mubr.f32.mxu0 %v1969_v6  ;;  %2294 = vmatprep.mubr.f32.mxu1 %v1971_v44  ;;  %v1999_v6 = vrot.slane %v3106_v35, %v3150_v15 }
 0xcc0   :  { %2220 = vmatmul.mubr.f32.gmra.mrb[34].mxu0 %v1968_v57  ;;  %2295 = vmatmul.mubr.f32.gmra.mrb[34].mxu1 %v1970_v58  ;;  %v1956_v13 = vmax.f32 %v1707_v59, 0.0  ;;  %v1958_v2 = vmax.f32 %v1784_v16, 0.0 }
 0xcc1   :  { %v1957_v3 = vmax.f32 %v1709_v63, 0.0  ;;  %v1959_v4 = vmax.f32 %v1786_v62, 0.0  ;;  %v1712_v9 = vpop.f32.mrb[22].mxu0  ;;  %v1789_v10 = vpop.f32.mrb[22].mxu1 }
 0xcc2   :  { %v1713_v14 = vadd.f32 %v1712_v9, %v1281_v36  ;;  %v1790_v30 = vadd.f32 %v1789_v10, %v1289_v41  ;;  %v1714_v28 = vpop.f32.mrb[23].mxu0  ;;  %v1791_v19 = vpop.f32.mrb[23].mxu1 }
 0xcc3   :  { %v1715_v23 = vadd.f32 %v1714_v28, %v1285_v42  ;;  %v1792_v24 = vadd.f32 %v1791_v19, %v1293_v1  ;;  %2364 = vmatprep.mubr.f32.mxu0 %v1957_v3  ;;  %2439 = vmatprep.mubr.f32.mxu1 %v1959_v4 }
 0xcc4   :  { %2365 = vmatmul.mubr.f32.vlgmr.msra.gmra.mrb[36].mxu0 %v1956_v13  ;;  %2440 = vmatmul.mubr.f32.vlgmr.msra.gmra.mrb[36].mxu1 %v1958_v2  ;;  %v1972_v32 = vmax.f32 %v1713_v14, 0.0  ;;  %v1974_v33 = vmax.f32 %v1790_v30, 0.0 }
 0xcc5   :  { %v1973_v26 = vmax.f32 %v1715_v23, 0.0  ;;  %v1975_v27 = vmax.f32 %v1792_v24, 0.0  ;;  %2451 = vmatpush1.xpose.msra.mxu0 %v1992_v20  ;;  %v1860_v29 = vpop.f32.mrb[24].mxu0  ;;  %v1937_v31 = vpop.f32.mrb[24].mxu1  ;;  %2526 = vmatpush1.xpose.msra.mxu1 %v1994_v21 }
 0xcc6   :  { %v1861_v36 = vadd.f32 %v1860_v29, %v1297_v0  ;;  %v1938_v37 = vadd.f32 %v1937_v31, %v1305_v11  ;;  %v1862_v38 = vpop.f32.mrb[25].mxu0  ;;  %v1939_v39 = vpop.f32.mrb[25].mxu1 }
 0xcc7   :  { %v1863_v40 = vadd.f32 %v1862_v38, %v1301_v12  ;;  %v1940_v41 = vadd.f32 %v1939_v39, %v1309_v25  ;;  %2369 = vmatprep.mubr.f32.mxu0 %v1973_v26  ;;  %2444 = vmatprep.mubr.f32.mxu1 %v1975_v27 }
 0xcc8   :  { %2370 = vmatmul.mubr.f32.gmra.mrb[38].mxu0 %v1972_v32  ;;  %2445 = vmatmul.mubr.f32.gmra.mrb[38].mxu1 %v1974_v33  ;;  %v1960_v48 = vmax.f32 %v1861_v36, 0.0  ;;  %v1962_v49 = vmax.f32 %v1938_v37, 0.0 }
 0xcc9   :  { %v1961_v34 = vmax.f32 %v1863_v40, 0.0  ;;  %v1963_v18 = vmax.f32 %v1940_v41, 0.0  ;;  %v1866_v42 = vpop.f32.mrb[26].mxu0  ;;  %v1943_v43 = vpop.f32.mrb[26].mxu1 }
 0xcca   :  { %v1867_v5 = vadd.f32 %v1866_v42, %v1297_v0  ;;  %v1944_v50 = vadd.f32 %v1943_v43, %v1305_v11  ;;  %v1868_v51 = vpop.f32.mrb[27].mxu0  ;;  %v1945_v52 = vpop.f32.mrb[27].mxu1 }
 0xccb   :  { %v1869_v7 = vadd.f32 %v1868_v51, %v1301_v12  ;;  %v1946_v53 = vadd.f32 %v1945_v52, %v1309_v25  ;;  %2514 = vmatprep.mubr.f32.mxu0 %v1961_v34  ;;  %2589 = vmatprep.mubr.f32.mxu1 %v1963_v18 }
 0xccc   :  { %2515 = vmatmul.mubr.f32.vlgmr.msra.gmra.mrb[40].mxu0 %v1960_v48  ;;  %2590 = vmatmul.mubr.f32.vlgmr.msra.gmra.mrb[40].mxu1 %v1962_v49  ;;  %v1976_v55 = vmax.f32 %v1867_v5, 0.0  ;;  %v1978_v46 = vmax.f32 %v1944_v50, 0.0 }
 0xccd   :  { %v1977_v8 = vmax.f32 %v1869_v7, 0.0  ;;  %v1979_v1 = vmax.f32 %v1946_v53, 0.0 }
 0xccf   :  { %2519 = vmatprep.mubr.f32.mxu0 %v1977_v8  ;;  %2594 = vmatprep.mubr.f32.mxu1 %v1979_v1 }
 0xcd0   :  { %2520 = vmatmul.mubr.f32.gmra.mrb[42].mxu0 %v1976_v55  ;;  %2595 = vmatmul.mubr.f32.gmra.mrb[42].mxu1 %v1978_v46 }
 0xd87   :  { %v2066_v44 = vpop.f32.mrb[28].mxu0  ;;  %v2141_v45 = vpop.f32.mrb[28].mxu1 }
 0xd88   :  { %v2067_v56 = vadd.f32 %v2066_v44, %v1999_v6  ;;  %v2068_v57 = vpop.f32.mrb[29].mxu0  ;;  %v2143_v58 = vpop.f32.mrb[29].mxu1 }
 0xd8a   :  { %v2142_v59 = vadd.f32 %v2141_v45, %v2067_v56 }
 0xd8b   :  { %v2071_v16 = vpop.f32.mrb[30].mxu0  ;;  %v2146_v60 = vpop.f32.mrb[30].mxu1 }
 0xd8c   :  { %v2072_v61 = vadd.f32 %v2071_v16, %v1999_v6  ;;  %v2073_v63 = vpop.f32.mrb[31].mxu0  ;;  %v2148_v62 = vpop.f32.mrb[31].mxu1 }
 0xd8d   :  { %v2637_v62 = vrot.slane %v3106_v35, %v3123_v47 }
 0xd8e   :  { %v2147_v0 = vadd.f32 %v2146_v60, %v2072_v61  ;;  %v2631_v60 = vrot.slane %v3106_v35, %v3132_v54 }
 0xd8f   :  { %v2216_v3 = vpop.f32.mrb[32].mxu0  ;;  %v2291_v4 = vpop.f32.mrb[32].mxu1 }
 0xd90   :  { %v2217_v9 = vadd.f32 %v2216_v3, %v2142_v59  ;;  %v2218_v10 = vpop.f32.mrb[33].mxu0  ;;  %v2293_v11 = vpop.f32.mrb[33].mxu1 }
 0xd92   :  { %v2292_v12 = vadd.f32 %v2291_v4, %v2217_v9 }
 0xd93   :  { %v2221_v13 = vpop.f32.mrb[34].mxu0  ;;  %v2296_v15 = vpop.f32.mrb[34].mxu1 }
 0xd94   :  { %v2222_v2 = vadd.f32 %v2221_v13, %v2147_v0  ;;  %v2223_v14 = vpop.f32.mrb[35].mxu0  ;;  %v2298_v30 = vpop.f32.mrb[35].mxu1 }
 0xd96   :  { %v2297_v28 = vadd.f32 %v2296_v15, %v2222_v2 }
 0xd97   :  { %v2366_v19 = vpop.f32.mrb[36].mxu0  ;;  %v2441_v20 = vpop.f32.mrb[36].mxu1 }
 0xd98   :  { %v2367_v21 = vadd.f32 %v2366_v19, %v2292_v12  ;;  %v2368_v23 = vpop.f32.mrb[37].mxu0  ;;  %v2443_v24 = vpop.f32.mrb[37].mxu1 }
 0xd9a   :  { %v2442_v25 = vadd.f32 %v2441_v20, %v2367_v21 }
 0xd9b   :  { %v2371_v26 = vpop.f32.mrb[38].mxu0  ;;  %v2446_v27 = vpop.f32.mrb[38].mxu1 }
 0xd9c   :  { %v2372_v29 = vadd.f32 %v2371_v26, %v2297_v28  ;;  %v2373_v31 = vpop.f32.mrb[39].mxu0  ;;  %v2448_v32 = vpop.f32.mrb[39].mxu1 }
 0xd9e   :  { %v2447_v33 = vadd.f32 %v2446_v27, %v2372_v29 }
 0xd9f   :  { %v2516_v36 = vpop.f32.mrb[40].mxu0  ;;  %v2591_v37 = vpop.f32.mrb[40].mxu1 }
 0xda0   :  { %v2517_v38 = vadd.f32 %v2516_v36, %v2442_v25  ;;  %v2518_v39 = vpop.f32.mrb[41].mxu0  ;;  %v2593_v40 = vpop.f32.mrb[41].mxu1 }
 0xda2   :  { %v2592_v41 = vadd.f32 %v2591_v37, %v2517_v38 }
 0xda3   :  { %v2521_v34 = vpop.f32.mrb[42].mxu0  ;;  %v2596_v18 = vpop.f32.mrb[42].mxu1 }
 0xda4   :  { %v2522_v42 = vadd.f32 %v2521_v34, %v2447_v33  ;;  %v2523_v43 = vpop.f32.mrb[43].mxu0  ;;  %v2598_v48 = vpop.f32.mrb[43].mxu1  ;;  %v2600_v49 = vadd.f32 %v2592_v41, %v3178_v17 }
 0xda6   :  { %v2597_v5 = vadd.f32 %v2596_v18, %v2522_v42  ;;  %v2602_v50 = vsel %vm105_vm0, %v2600_v49, 0.0 }
 0xda7   :  { %2603 = vadd.xlane.f32.xlu0 %v2602_v50 }
 0xda8   :  { %v2601_v51 = vadd.f32 %v2597_v5, %v3184_v22 }
 0xdaa   :  { %v2605_v52 = vsel %vm105_vm0, %v2601_v51, 0.0 }
 0xdab   :  { %2606 = vadd.xlane.f32.xlu1 %v2605_v52 }
 0xe34   :  { %v2604_v7 = vpop.xlane.xlu0 %2603 }
 0xe35   :  { %v2608_v53 = vmul.f32 0.125, %v2604_v7 }
 0xe37   :  { %v2610_v8 = vsub.f32 %v2600_v49, %v2608_v53 }
 0xe38   :  { %v2607_v1 = vpop.xlane.xlu1 %2606 }
 0xe39   :  { %v2609_v55 = vmul.f32 0.125, %v2607_v1  ;;  %v2612_v46 = vmul.f32 %v2610_v8, %v2610_v8 }
 0xe3b   :  { %v2611_v6 = vsub.f32 %v2601_v51, %v2609_v55  ;;  %v2614_v44 = vsel %vm105_vm0, %v2612_v46, 0.0 }
 0xe3c   :  { %2615 = vadd.xlane.f32.xlu0 %v2614_v44 }
 0xe3d   :  { %v2613_v17 = vmul.f32 %v2611_v6, %v2611_v6 }
 0xe3f   :  { %v2617_v45 = vsel %vm105_vm0, %v2613_v17, 0.0 }
 0xe40   :  { %2618 = vadd.xlane.f32.xlu1 %v2617_v45 }
 0xec9   :  { %v2616_v56 = vpop.xlane.xlu0 %2615 }
 0xeca   :  { %v2620_v57 = vmul.f32 0.125, %v2616_v56 }
 0xecc   :  { %v2622_v22 = vadd.f32 1e-05, %v2620_v57 }
 0xecd   :  { %v2619_v58 = vpop.xlane.xlu1 %2618 }
 0xece   :  { %2864 = vrsqrt.f32 %v2622_v22  ;;  %v2621_v59 = vmul.f32 0.125, %v2619_v58 }
 0xed0   :  { %v2623_v16 = vadd.f32 1e-05, %v2621_v59 }
 0xed2   :  { %2866 = vrsqrt.f32 %v2623_v16 }
 0xed8   :  { %v2865_v61 = vpop.eup %2864 }
 0xed9   :  { %v2626_v63 = vmul.f32 %v2865_v61, %v2610_v8 }
 0xedb   :  { %v2632_v0 = vmul.f32 %v2631_v60, %v2626_v63 }
 0xedc   :  { %v2867_v3 = vpop.eup %2866 }
 0xedd   :  { %v2627_v4 = vmul.f32 %v2867_v3, %v2611_v6  ;;  %v2638_v9 = vadd.f32 %v2637_v62, %v2632_v0 }
 0xedf   :  { %v2633_v10 = vmul.f32 %v2631_v60, %v2627_v4  ;;  %2640 = vst.msk [vmem:[#allocation7] sm:$0xff] %vm105_vm0, %v2638_v9 }
 0xee1   :  { %v2639_v11 = vadd.f32 %v2637_v62, %v2633_v10 }
 0xee3   :  { %2641 = vst.msk [vmem:[#allocation7 + $0x8] sm:$0xff] %vm105_vm0, %v2639_v11 }
 0xee4   :  { %2923 = shalt.err (!%p2920_p6)
}
 0xee5   :  { %s2924_s14 = scalar_lea.hbm %s3286_s4, 256 }
 0xee6   :  { %p2925_p7 = scmp.ne.s32.totalorder %s3286_s4, %s2924_s14  ;;  %p2928_p8 = scmp.lt.u32.totalorder %s2924_s14, %s3286_s4 }
 0xee8   :  { %p2930_p9 = pnand %p2928_p8, %p2925_p7 }
 0xeea   :  { %2933 = shalt.err (!%p2930_p9)
}
 0xeeb   :  { %s2947_s19 = smov 8  }
 0xeec   :  { %2653 = dma.vmem_to_hbm [thread:$0]  %s2648_s11, 256, %s3286_s4, [#allocation4], %s2942_s26, %s2942_s26, %s2947_s19  }
 0xeed   :  { %2938 = dma.done.wait [#allocation4], 256  }
 0xeee   :  { %2939 = vsyncadd [#allocation4], 4294967040 }
 0xeef   :  { %2657 = vsyncpa [#allocation3], 1 }
 0xef0   :  { %2658 = vsyncpa [#allocation6], 1 }
 0xef1   :  { %2659 = vsyncpa [#allocation4], 1 }

</bundles_post_ra>
